<compile_context>
chip_gen: v7x
topology: tpu7x:2x2x1
jax: 0.10.0
libtpu: 0.0.40
codegen_flags: <defaults>
</compile_context>

<pallas_src>
import functools

import numpy as np
import jax
import jax.numpy as jnp
from jax import lax
from jax.experimental import pallas as pl
from jax.experimental.pallas import tpu as pltpu

LEAKY_SLOPE = 0.1
SEARCH_RANGE = 4
DIM_CORR = (SEARCH_RANGE * 2 + 1) ** 2        # 81
OUTPUT_LEVEL = 4
NUM_CHS = [3, 64, 96, 128, 192, 256, 512]
CONV_ROW_TILE = 2048                          # target flat-row tile for convs


def _round_up(x, m):
    return ((x + m - 1) // m) * m


def _default_vmem_limit():
    """Generation-aware scoped-VMEM budget (v5e/v6e: 128 MiB, v7x: 64 MiB)."""
    try:
        cap = int(pltpu.get_tpu_info().vmem_capacity_bytes)
        return max(16 * 1024 * 1024, min((cap * 3) // 4, 96 * 1024 * 1024))
    except Exception:
        return None   # let the compiler use its default scoped limit


VMEM_LIMIT = _default_vmem_limit()


def _compiler_params(sem):
    return pltpu.CompilerParams(dimension_semantics=sem,
                                vmem_limit_bytes=VMEM_LIMIT)


def to_nhwc(x):
    return jnp.transpose(x, (0, 2, 3, 1))


def to_nchw(x):
    return jnp.transpose(x, (0, 3, 1, 2))


# -----------------------------------------------------------------------------
# Pallas kernel 1: fused tap-matmul conv on flattened rows (tiled + halo block)
# -----------------------------------------------------------------------------
def _conv_flat_kernel(xa_ref, xb_ref, w_ref, b_ref, o_ref, *, taps, act):
    # xa_ref: (1, TM, Cin) bf16  current flat-row tile
    # xb_ref: (1, TH, Cin) bf16  halo rows immediately after the tile
    # w_ref:  (T, Cin, Cout) bf16, b_ref: (1, Cout) f32, o_ref: (1, TM, Cout)
    tm = xa_ref.shape[1]
    xall = jnp.concatenate([xa_ref[0], xb_ref[0]], axis=0)   # (TM + TH, Cin)
    acc = None
    for t, off in enumerate(taps):
        patch = xall[off:off + tm]                           # (TM, Cin) bf16
        d = jnp.dot(patch, w_ref[t], preferred_element_type=jnp.float32)
        acc = d if acc is None else acc + d
    acc = acc + b_ref[...]
    if act == "leaky":
        acc = jnp.where(acc >= 0.0, acc, LEAKY_SLOPE * acc)
    elif act == "sigmoid":
        acc = jax.nn.sigmoid(acc)
    o_ref[0] = acc.astype(o_ref.dtype)


def _run_flat_conv(ximg, wt, b, Hout, Wout, taps, act, out_dtype):
    """ximg: (B, Himg, Wimg, Cin) bf16 spatially padded image.
    Output ext-row m of the flattened image is sum_t x[m + taps[t]] @ wt[t] + b.
    Each image row has (Wimg - Wout) junk columns that are dropped here."""
    B, Himg, Wimg, Cin = ximg.shape
    T, _, Cout = wt.shape
    M = Hout * Wimg
    halo = max(taps)
    TH = _round_up(halo, 8)
    TM = TH * max(1, CONV_ROW_TILE // TH)
    if TM >= M:
        TM = TH * (-(-M // TH))
    nM = -(-M // TM)
    step_b = TM // TH
    Ltot = nM * TM + TH

    xf = ximg.reshape(B, Himg * Wimg, Cin)
    xf = jnp.pad(xf, ((0, 0), (0, Ltot - Himg * Wimg), (0, 0)))
    wt = wt.astype(jnp.bfloat16)
    bb = b.reshape(1, Cout).astype(jnp.float32)

    out = pl.pallas_call(
        functools.partial(_conv_flat_kernel, taps=tuple(taps), act=act),
        out_shape=jax.ShapeDtypeStruct((B, nM * TM, Cout), out_dtype),
        grid=(B, nM),
        in_specs=[
            pl.BlockSpec((1, TM, Cin), lambda bi, mi: (bi, mi, 0)),
            pl.BlockSpec((1, TH, Cin), lambda bi, mi: (bi, (mi + 1) * step_b, 0)),
            pl.BlockSpec((T, Cin, Cout), lambda bi, mi: (0, 0, 0)),
            pl.BlockSpec((1, Cout), lambda bi, mi: (0, 0)),
        ],
        out_specs=pl.BlockSpec((1, TM, Cout), lambda bi, mi: (bi, mi, 0)),
        compiler_params=_compiler_params(("parallel", "parallel")),
    )(xf, xf, wt, bb)
    out = out[:, :M].reshape(B, Hout, Wimg, Cout)[:, :, :Wout, :]
    return out


def _conv_nhwc_s1(x, w, b, dilation, act, out_dtype):
    B, H, W, Cin = x.shape
    Cout, _, k, _ = w.shape
    pad = ((k - 1) * dilation) // 2
    Wp = W + 2 * pad
    xp = jnp.pad(x.astype(jnp.bfloat16),
                 ((0, 0), (pad, pad), (pad, pad), (0, 0)))
    wt = jnp.transpose(w, (2, 3, 1, 0)).reshape(k * k, Cin, Cout)
    taps = [(i * Wp + j) * dilation for i in range(k) for j in range(k)]
    return _run_flat_conv(xp, wt, b, H, W, taps, act, out_dtype)


def _conv_nhwc_s2(x, w, b, act, out_dtype):
    """3x3 stride-2 conv via space-to-depth -> 2x2 stride-1 conv on the phase
    image (K per tap = 4*Cin), reusing the fused flat-row kernel."""
    B, H, W, Cin = x.shape
    Cout, _, k, _ = w.shape
    xp = jnp.pad(x.astype(jnp.bfloat16), ((0, 0), (1, 1), (1, 1), (0, 0)))
    Ha, Wa = (H + 2) // 2, (W + 2) // 2
    ph = xp.reshape(B, Ha, 2, Wa, 2, Cin)
    ph = jnp.transpose(ph, (0, 1, 3, 2, 4, 5)).reshape(B, Ha, Wa, 4 * Cin)

    zero = jnp.zeros((Cin, Cout), w.dtype)
    wq = []
    for da in range(2):
        for db in range(2):
            blocks = []
            for r in range(2):
                for s in range(2):
                    i, j = 2 * da + r, 2 * db + s
                    if i < 3 and j < 3:
                        blocks.append(jnp.transpose(w[:, :, i, j], (1, 0)))
                    else:
                        blocks.append(zero)
            wq.append(jnp.concatenate(blocks, axis=0))       # (4*Cin, Cout)
    w2 = jnp.stack(wq, axis=0)                               # (4, 4*Cin, Cout)

    taps = [0, 1, Wa, Wa + 1]
    return _run_flat_conv(ph, w2, b, H // 2, W // 2, taps, act, out_dtype)


def conv2d_nhwc(x, w, b, stride=1, dilation=1, act="leaky",
                out_dtype=jnp.bfloat16):
    if stride == 1:
        return _conv_nhwc_s1(x, w, b, dilation, act, out_dtype)
    if stride == 2 and w.shape[2] == 3 and x.shape[1] % 2 == 0 and x.shape[2] % 2 == 0:
        return _conv_nhwc_s2(x, w, b, act, out_dtype)
    raise NotImplementedError("only stride-1 and even-size stride-2 3x3 convs")


def conv_p(x, p, stride=1, dilation=1, act="leaky", out_dtype=jnp.bfloat16):
    return conv2d_nhwc(x, p["w"], p["b"], stride=stride, dilation=dilation,
                       act=act, out_dtype=out_dtype)


def conv_multi_head(x, plist, dilation=1):
    """Fuse small conv heads (sf:3 + disp:1, feat:6 + mask:1) into one wider conv."""
    w = jnp.concatenate([p["w"] for p in plist], axis=0)
    b = jnp.concatenate([p["b"] for p in plist], axis=0)
    out = conv2d_nhwc(x, w, b, stride=1, dilation=dilation, act="none",
                      out_dtype=jnp.float32)
    sizes = [int(p["w"].shape[0]) for p in plist]
    splits = [int(s) for s in np.cumsum(sizes)[:-1]]
    return jnp.split(out, splits, axis=-1)


# -----------------------------------------------------------------------------
# Pallas kernel 2: PWC correlation (cost volume) + fused LeakyReLU (NHWC, bf16)
# -----------------------------------------------------------------------------
def _corr_kernel(x1_ref, x2p_ref, o_ref, *, H, W, md):
    d = 2 * md + 1
    x1 = x1_ref[0].astype(jnp.float32)                       # (H, W, C)
    inv_c = 1.0 / x1.shape[-1]
    for dj in range(d):
        # one sub-lane (W) slice per dj, hoisted out of the di loop
        x2c = x2p_ref[0, :, dj:dj + W, :].astype(jnp.float32)   # (H+2md, W, C)
        for di in range(d):
            x2s = x2c[di:di + H]                             # leading-dim slice
            r = jnp.sum(x1 * x2s, axis=-1) * inv_c           # (H, W)
            r = jnp.where(r >= 0.0, r, LEAKY_SLOPE * r)
            o_ref[0, di * d + dj] = r.astype(o_ref.dtype)


def correlation_leaky(x1, x2, md=SEARCH_RANGE):
    """x1, x2: (B, H, W, C) NHWC.  Returns (B, H, W, 81) bf16 with LeakyReLU
    fused.  Call sites batch the 4 forward/backward variants along B."""
    B, H, W, C = x1.shape
    d = 2 * md + 1
    x1b = x1.astype(jnp.bfloat16)
    x2p = jnp.pad(x2.astype(jnp.bfloat16),
                  ((0, 0), (md, md), (md, md), (0, 0)))
    out = pl.pallas_call(
        functools.partial(_corr_kernel, H=H, W=W, md=md),
        out_shape=jax.ShapeDtypeStruct((B, d * d, H, W), jnp.bfloat16),
        grid=(B,),
        in_specs=[
            pl.BlockSpec((1, H, W, C), lambda b: (b, 0, 0, 0)),
            pl.BlockSpec((1, H + 2 * md, W + 2 * md, C), lambda b: (b, 0, 0, 0)),
        ],
        out_specs=pl.BlockSpec((1, d * d, H, W), lambda b: (b, 0, 0, 0)),
        compiler_params=_compiler_params(("parallel",)),
    )(x1b, x2p)
    return jnp.transpose(out, (0, 2, 3, 1))                  # NHWC, 81 channels


# -----------------------------------------------------------------------------
# Plain-JAX glue: interpolation, grid-sample, scene-flow warping
# -----------------------------------------------------------------------------
def interpolate_bilinear(x, oh, ow):
    """x: (B, C, H, W) f32, align_corners=True bilinear resize."""
    B, C, H, W = x.shape
    if (H, W) == (oh, ow):
        return x

    def coords(n_out, n_in):
        if n_out == 1:
            return jnp.zeros((1,), jnp.float32)
        return jnp.linspace(0.0, n_in - 1.0, n_out)

    ys, xs = coords(oh, H), coords(ow, W)
    iy0 = jnp.floor(ys).astype(jnp.int32)
    ix0 = jnp.floor(xs).astype(jnp.int32)
    iy1 = jnp.minimum(iy0 + 1, H - 1)
    ix1 = jnp.minimum(ix0 + 1, W - 1)
    wy = (ys - iy0)[None, None, :, None]
    wx = (xs - ix0)[None, None, None, :]
    r0, r1 = jnp.take(x, iy0, axis=2), jnp.take(x, iy1, axis=2)
    v00, v01 = jnp.take(r0, ix0, axis=3), jnp.take(r0, ix1, axis=3)
    v10, v11 = jnp.take(r1, ix0, axis=3), jnp.take(r1, ix1, axis=3)
    top = v00 * (1 - wx) + v01 * wx
    bot = v10 * (1 - wx) + v11 * wx
    return top * (1 - wy) + bot * wy


def upsample_outputs_as(input_list, target_shapes):
    return [interpolate_bilinear(x, hw[0], hw[1])
            for x, hw in zip(input_list, target_shapes)]


def grid_sample_bilinear_nhwc(img, grid):
    """img (B,H,W,C), grid (B,Ho,Wo,2) normalized (x,y); zero padding."""
    B, H, W, C = img.shape
    Ho, Wo = grid.shape[1], grid.shape[2]
    gx = (grid[..., 0] + 1.0) * (W - 1) / 2.0
    gy = (grid[..., 1] + 1.0) * (H - 1) / 2.0
    x0, y0 = jnp.floor(gx), jnp.floor(gy)
    x1, y1 = x0 + 1, y0 + 1
    wx = (gx - x0)[..., None]
    wy = (gy - y0)[..., None]
    flat = img.reshape(B, H * W, C)

    def sample(iy, ix):
        valid = (ix >= 0) & (ix <= W - 1) & (iy >= 0) & (iy <= H - 1)
        ixc = jnp.clip(ix, 0, W - 1).astype(jnp.int32)
        iyc = jnp.clip(iy, 0, H - 1).astype(jnp.int32)
        idx = (iyc * W + ixc).reshape(B, Ho * Wo, 1)
        idx = jnp.broadcast_to(idx, (B, Ho * Wo, C))
        v = jnp.take_along_axis(flat, idx, axis=1).reshape(B, Ho, Wo, C)
        return v * valid[..., None].astype(img.dtype)

    v00, v01 = sample(y0, x0), sample(y0, x1)
    v10, v11 = sample(y1, x0), sample(y1, x1)
    return (v00 * (1 - wx) * (1 - wy) + v01 * wx * (1 - wy)
            + v10 * (1 - wx) * wy + v11 * wx * wy)


def intrinsic_scale(k, sy, sx):
    fx, fy = k[:, 0, 0] * sx, k[:, 1, 1] * sy
    cx, cy = k[:, 0, 2] * sx, k[:, 1, 2] * sy
    z, o = jnp.zeros_like(fx), jnp.ones_like(fx)
    return jnp.stack([jnp.stack([fx, z, cx], 1),
                      jnp.stack([z, fy, cy], 1),
                      jnp.stack([z, z, o], 1)], axis=1)


def warping_layer_sf(x, sceneflow, disp, k1, aug_size):
    """x: (B,H,W,C) NHWC feature; sceneflow/disp: NCHW f32.  Returns NHWC."""
    B, H, W, C = x.shape
    disp = interpolate_bilinear(disp, H, W) * W
    sf = interpolate_bilinear(sceneflow, H, W)
    sy = H / aug_size[:, 0]
    sx = W / aug_size[:, 1]
    k_s = intrinsic_scale(k1, sy, sx)
    disp_safe = disp + (disp == 0).astype(disp.dtype) * 1e-8
    depth = k_s[:, 0, 0].reshape(B, 1, 1, 1) * 0.54 / disp_safe
    depth = jnp.clip(depth, 1e-3, 80.0)

    xx = jnp.arange(W, dtype=jnp.float32)
    yy = jnp.arange(H, dtype=jnp.float32)
    gx, gy = jnp.meshgrid(xx, yy)
    pix = jnp.stack([gx, gy, jnp.ones_like(gx)], axis=0).reshape(1, 3, H * W)
    pix = jnp.broadcast_to(pix, (B, 3, H * W))
    kinv = jnp.linalg.inv(k_s)
    pts = jnp.matmul(kinv, pix) * depth.reshape(B, 1, H * W)
    pts_t = pts + sf.reshape(B, 3, H * W)
    proj = jnp.matmul(k_s, pts_t)
    coord = proj[:, 0:2] / (proj[:, 2:3] + 1e-8)
    nx = coord[:, 0] / max(W - 1, 1) * 2.0 - 1.0
    ny = coord[:, 1] / max(H - 1, 1) * 2.0 - 1.0
    grid = jnp.stack([nx, ny], axis=-1).reshape(B, H, W, 2)

    x32 = x.astype(jnp.float32)
    x_warp = grid_sample_bilinear_nhwc(x32, grid)
    mask = grid_sample_bilinear_nhwc(jnp.ones_like(x32), grid)
    mask = (mask >= 1.0).astype(jnp.float32)
    return (x_warp * mask).astype(x.dtype)


def flow_horizontal_flip(f):
    f = jnp.flip(f, axis=3)
    return jnp.concatenate([-f[:, 0:1], f[:, 1:]], axis=1)


def cm_horizontal_flip(cm):
    # TODO(synk): exact cm_horizontal_flip semantics not in the provided source;
    # negate x-translation / yaw / roll components of the 6-DoF vector.
    sign = jnp.array([-1.0, 1.0, 1.0, 1.0, -1.0, -1.0], jnp.float32)
    return cm * sign


# -----------------------------------------------------------------------------
# Parameter construction (deterministic MSRA-style init)
# -----------------------------------------------------------------------------
class ParamFactory:
    def __init__(self, seed=0):
        self.key = jax.random.PRNGKey(seed)

    def conv(self, cin, cout, k=3):
        self.key, sub = jax.random.split(self.key)
        fan_in = cin * k * k
        w = jax.random.normal(sub, (cout, cin, k, k), jnp.float32) * jnp.sqrt(2.0 / fan_in)
        return {"w": w, "b": jnp.zeros((cout,), jnp.float32)}


def make_feature_extractor(pf, num_chs):
    return [(pf.conv(cin, cout), pf.conv(cout, cout))
            for cin, cout in zip(num_chs[:-1], num_chs[1:])]


def make_sf_decoder(pf, ch_in):
    return {"c1": pf.conv(ch_in, 128), "c2": pf.conv(128, 128), "c3": pf.conv(128, 96),
            "c4": pf.conv(96, 64), "c5": pf.conv(64, 32),
            "sf": pf.conv(32, 3), "d1": pf.conv(32, 1)}


def make_cam_mask(pf, ch_in):
    # TODO(synk): CameraMotionMaskNet source not provided; architecture inferred.
    return {"c1": pf.conv(ch_in, 128), "c2": pf.conv(128, 64), "c3": pf.conv(64, 32),
            "feat": pf.conv(32, 6), "mask": pf.conv(32, 1)}


def make_context(pf, ch_in):
    return {"c1": pf.conv(ch_in, 128), "c2": pf.conv(128, 128), "c3": pf.conv(128, 128),
            "c4": pf.conv(128, 96), "c5": pf.conv(96, 64), "c6": pf.conv(64, 32),
            "sf": pf.conv(32, 3), "d1": pf.conv(32, 1)}


def build_params(seed=0):
    pf = ParamFactory(seed)
    params = {"extractor": make_feature_extractor(pf, NUM_CHS),
              "static": [], "dynamic": [], "cam": [], "upconv": []}
    for level, ch in enumerate(NUM_CHS[::-1]):
        if level > OUTPUT_LEVEL:
            break
        if level == 0:
            nin = DIM_CORR + ch + ch
            ncm = DIM_CORR + ch + ch
        else:
            nin = DIM_CORR + ch + ch + 3 + 1
            ncm = DIM_CORR + ch + ch + 6 + 1
            params["upconv"].append(pf.conv(32, 32))
        params["static"].append(make_sf_decoder(pf, nin))
        params["dynamic"].append(make_sf_decoder(pf, nin))
        params["cam"].append(make_cam_mask(pf, ncm))
    params["context"] = make_context(pf, 32 + 3 + 1 + 1)
    return params


# -----------------------------------------------------------------------------
# Sub-module forwards (all features NHWC bf16; heads NCHW f32)
# -----------------------------------------------------------------------------
def feature_extractor_fwd(layers, x):
    pyr = []
    for pA, pB in layers:
        x = conv_p(x, pA, stride=2)
        x = conv_p(x, pB, stride=1)
        pyr.append(x)
    return pyr[::-1]


def sf_decoder_fwd(p, x):
    x = conv_p(x, p["c1"]); x = conv_p(x, p["c2"]); x = conv_p(x, p["c3"])
    x = conv_p(x, p["c4"]); x_out = conv_p(x, p["c5"])
    sf, disp1 = conv_multi_head(x_out, [p["sf"], p["d1"]])       # fused N=4 head
    return x_out, to_nchw(sf), to_nchw(disp1)


def cam_mask_fwd(p, x):
    h = conv_p(x, p["c1"]); h = conv_p(h, p["c2"]); h = conv_p(h, p["c3"])
    cm_feats, mask_logit = conv_multi_head(h, [p["feat"], p["mask"]])  # fused N=7
    cm_feats = to_nchw(cm_feats)
    mask = jax.nn.sigmoid(to_nchw(mask_logit))
    cm = jnp.mean(cm_feats, axis=(2, 3))            # (B, 6) pooled camera motion
    return cm_feats, cm, mask


def context_fwd(p, x):
    x = conv_p(x, p["c1"], dilation=1)
    x = conv_p(x, p["c2"], dilation=2)
    x = conv_p(x, p["c3"], dilation=4)
    x = conv_p(x, p["c4"], dilation=8)
    x = conv_p(x, p["c5"], dilation=16)
    x = conv_p(x, p["c6"], dilation=1)
    sf, d1 = conv_multi_head(x, [p["sf"], p["d1"]])
    disp1 = jax.nn.sigmoid(to_nchw(d1)) * 0.3
    return to_nchw(sf), disp1


def upconv_fwd(p, x):
    x = jnp.repeat(jnp.repeat(x, 2, axis=1), 2, axis=2)   # nearest x2 (NHWC)
    return conv_p(x, p)


# -----------------------------------------------------------------------------
# run_pwc / forward
# -----------------------------------------------------------------------------
def run_pwc(params, input_dict, l1_raw, l2_raw, r1_raw, r2_raw, k_l1, k_l2, k_r1, k_r2):
    output_dict = {}
    B = l1_raw.shape[0]
    Hraw, Wraw = l1_raw.shape[2], l1_raw.shape[3]
    aug_size = input_dict["aug_size"]
    bf = jnp.bfloat16

    # Share extractor weights: l1 and l2 run through the pyramid as one 2B batch.
    both = to_nhwc(jnp.concatenate([l1_raw, l2_raw], axis=0)).astype(bf)
    both_pyr = feature_extractor_fwd(params["extractor"], both)
    l1_pyramid = [f[:B] for f in both_pyr]
    l2_pyramid = [f[B:] for f in both_pyr]
    pyr_shapes = [(int(f.shape[1]), int(f.shape[2])) for f in l1_pyramid] + [(Hraw, Wraw)]

    sceneflows_f_s, sceneflows_f_d = [], []
    sceneflows_b_s, sceneflows_b_d = [], []
    rigidity_masks_f, rigidity_masks_b = [], []
    cam_motions_f, cam_motions_b = [], []
    disps_l1_s, disps_l1_d, disps_l2_s, disps_l2_d = [], [], [], []

    for level in range(OUTPUT_LEVEL + 1):
        x1 = l1_pyramid[level]
        x2 = l2_pyramid[level]
        hw = (x1.shape[1], x1.shape[2])

        if level == 0:
            x2_warp_s, x2_warp_d = x2, x2
            x1_warp_s, x1_warp_d = x1, x1
        else:
            flow_f_s = interpolate_bilinear(flow_f_s, *hw)
            flow_f_d = interpolate_bilinear(flow_f_d, *hw)
            flow_b_s = interpolate_bilinear(flow_b_s, *hw)
            flow_b_d = interpolate_bilinear(flow_b_d, *hw)
            disp_l1_s = interpolate_bilinear(disp_l1_s, *hw)
            disp_l1_d = interpolate_bilinear(disp_l1_d, *hw)
            disp_l2_s = interpolate_bilinear(disp_l2_s, *hw)
            disp_l2_d = interpolate_bilinear(disp_l2_d, *hw)
            cm_feats_f = interpolate_bilinear(cm_feats_f, *hw)
            cm_feats_b = interpolate_bilinear(cm_feats_b, *hw)
            mask_f = interpolate_bilinear(mask_f, *hw)
            mask_b = interpolate_bilinear(mask_b, *hw)
            # 4 upconv calls share weights -> one batched pass.
            ups = upconv_fwd(params["upconv"][level - 1],
                             jnp.concatenate([x1_out_s, x1_out_d, x2_out_s, x2_out_d], 0))
            x1_out_s, x1_out_d, x2_out_s, x2_out_d = jnp.split(ups, 4, axis=0)
            x2_warp_s = warping_layer_sf(x2, flow_f_s, disp_l1_s, k_l1, aug_size)
            x2_warp_d = warping_layer_sf(x2, flow_f_d, disp_l1_d, k_l1, aug_size)
            x1_warp_s = warping_layer_sf(x1, flow_b_s, disp_l2_s, k_l2, aug_size)
            x1_warp_d = warping_layer_sf(x1, flow_b_d, disp_l2_d, k_l2, aug_size)

        # All four correlations of this level in one Pallas call (grid 4B).
        corr_all = correlation_leaky(
            jnp.concatenate([x1, x1, x2, x2], 0),
            jnp.concatenate([x2_warp_s, x2_warp_d, x1_warp_s, x1_warp_d], 0))
        (corr_f_s, corr_f_d, corr_b_s, corr_b_d) = jnp.split(corr_all, 4, axis=0)

        if level == 0:
            inp_s = jnp.concatenate([
                jnp.concatenate([corr_f_s, x1, x2], -1),
                jnp.concatenate([corr_b_s, x2, x1], -1)], 0)
            xo_s, fl_s, dp_s = sf_decoder_fwd(params["static"][level], inp_s)
            x1_out_s, x2_out_s = xo_s[:B], xo_s[B:]
            flow_f_s, flow_b_s = fl_s[:B], fl_s[B:]
            disp_l1_s, disp_l2_s = dp_s[:B], dp_s[B:]

            inp_d = jnp.concatenate([
                jnp.concatenate([corr_f_d, x1, x2], -1),
                jnp.concatenate([corr_b_d, x2, x1], -1)], 0)
            xo_d, fl_d, dp_d = sf_decoder_fwd(params["dynamic"][level], inp_d)
            x1_out_d, x2_out_d = xo_d[:B], xo_d[B:]
            flow_f_d, flow_b_d = fl_d[:B], fl_d[B:]
            disp_l1_d, disp_l2_d = dp_d[:B], dp_d[B:]

            # NOTE: the reference uses the dynamic-warped backward corr here.
            inp_cm = jnp.concatenate([
                jnp.concatenate([corr_f_s, x1, x2], -1),
                jnp.concatenate([corr_b_d, x2, x1], -1)], 0)
            cmf, cm, mk = cam_mask_fwd(params["cam"][level], inp_cm)
            cm_feats_f, cm_feats_b = cmf[:B], cmf[B:]
            cm_f, cm_b = cm[:B], cm[B:]
            mask_f, mask_b = mk[:B], mk[B:]
        else:
            ff_s = to_nhwc(flow_f_s).astype(bf); fb_s = to_nhwc(flow_b_s).astype(bf)
            ff_d = to_nhwc(flow_f_d).astype(bf); fb_d = to_nhwc(flow_b_d).astype(bf)
            d1_s = to_nhwc(disp_l1_s).astype(bf); d2_s = to_nhwc(disp_l2_s).astype(bf)
            d1_d = to_nhwc(disp_l1_d).astype(bf); d2_d = to_nhwc(disp_l2_d).astype(bf)

            inp_s = jnp.concatenate([
                jnp.concatenate([corr_f_s, x1, x2, ff_s, d1_s], -1),
                jnp.concatenate([corr_b_s, x2, x1, fb_s, d2_s], -1)], 0)
            _, fl_s_res, dp_s = sf_decoder_fwd(params["static"][level], inp_s)
            flow_f_s_res, flow_b_s_res = fl_s_res[:B], fl_s_res[B:]
            disp_l1_s, disp_l2_s = dp_s[:B], dp_s[B:]

            inp_d = jnp.concatenate([
                jnp.concatenate([corr_f_d, x1, x2, ff_d, d1_d], -1),
                jnp.concatenate([corr_b_d, x2, x1, fb_d, d2_d], -1)], 0)
            _, fl_d_res, dp_d = sf_decoder_fwd(params["dynamic"][level], inp_d)
            flow_f_d_res, flow_b_d_res = fl_d_res[:B], fl_d_res[B:]
            disp_l1_d, disp_l2_d = dp_d[:B], dp_d[B:]

            cmf_f = to_nhwc(cm_feats_f).astype(bf); cmf_b = to_nhwc(cm_feats_b).astype(bf)
            m_f = to_nhwc(mask_f).astype(bf); m_b = to_nhwc(mask_b).astype(bf)
            inp_cm = jnp.concatenate([
                jnp.concatenate([corr_f_s, x1, x2, cmf_f, m_f], -1),
                jnp.concatenate([corr_b_s, x2, x1, cmf_b, m_b], -1)], 0)
            cmf, cm, mk = cam_mask_fwd(params["cam"][level], inp_cm)
            cm_feats_f, cm_feats_b = cmf[:B], cmf[B:]
            cm_f, cm_b = cm[:B], cm[B:]
            mask_f, mask_b = mk[:B], mk[B:]

            flow_f_s = flow_f_s + flow_f_s_res
            flow_f_d = flow_f_d + flow_f_d_res
            flow_b_s = flow_b_s + flow_b_s_res
            flow_b_d = flow_b_d + flow_b_d_res

        if level != OUTPUT_LEVEL:
            disp_l1_s = jax.nn.sigmoid(disp_l1_s) * 0.3
            disp_l1_d = jax.nn.sigmoid(disp_l1_d) * 0.3
            disp_l2_s = jax.nn.sigmoid(disp_l2_s) * 0.3
            disp_l2_d = jax.nn.sigmoid(disp_l2_d) * 0.3
            sceneflows_f_s.append(flow_f_s); sceneflows_f_d.append(flow_f_d)
            sceneflows_b_s.append(flow_b_s); sceneflows_b_d.append(flow_b_d)
            disps_l1_s.append(disp_l1_s); disps_l1_d.append(disp_l1_d)
            disps_l2_s.append(disp_l2_s); disps_l2_d.append(disp_l2_d)
            rigidity_masks_f.append(mask_f); rigidity_masks_b.append(mask_b)
            cam_motions_f.append(cm_f); cam_motions_b.append(cm_b)
        else:
            # 4 context-network calls share weights -> one batched pass.
            m_f = to_nhwc(mask_f).astype(bf)
            m_b = to_nhwc(mask_b).astype(bf)
            ctx_in = jnp.concatenate([
                jnp.concatenate([x1_out_s, to_nhwc(flow_f_s).astype(bf),
                                 to_nhwc(disp_l1_s).astype(bf), m_f], -1),
                jnp.concatenate([x1_out_d, to_nhwc(flow_f_d).astype(bf),
                                 to_nhwc(disp_l1_d).astype(bf), m_f], -1),
                jnp.concatenate([x2_out_s, to_nhwc(flow_b_s).astype(bf),
                                 to_nhwc(disp_l2_s).astype(bf), m_b], -1),
                jnp.concatenate([x2_out_d, to_nhwc(flow_b_d).astype(bf),
                                 to_nhwc(disp_l2_d).astype(bf), m_b], -1)], 0)
            flow_res_all, disp_all = context_fwd(params["context"], ctx_in)
            (flow_res_f_s, flow_res_f_d,
             flow_res_b_s, flow_res_b_d) = jnp.split(flow_res_all, 4, axis=0)
            disp_l1_s, disp_l1_d, disp_l2_s, disp_l2_d = jnp.split(disp_all, 4, axis=0)
            flow_f_s = flow_f_s + flow_res_f_s
            flow_f_d = flow_f_d + flow_res_f_d
            flow_b_s = flow_b_s + flow_res_b_s
            flow_b_d = flow_b_d + flow_res_b_d
            sceneflows_f_s.append(flow_f_s); sceneflows_f_d.append(flow_f_d)
            sceneflows_b_s.append(flow_b_s); sceneflows_b_d.append(flow_b_d)
            disps_l1_s.append(disp_l1_s); disps_l1_d.append(disp_l1_d)
            disps_l2_s.append(disp_l2_s); disps_l2_d.append(disp_l2_d)
            rigidity_masks_f.append(mask_f); rigidity_masks_b.append(mask_b)
            cam_motions_f.append(cm_f); cam_motions_b.append(cm_b)
            break

    shapes_rev = pyr_shapes[::-1]
    output_dict["flow_f_s"] = upsample_outputs_as(sceneflows_f_s[::-1], shapes_rev)
    output_dict["flow_f_d"] = upsample_outputs_as(sceneflows_f_d[::-1], shapes_rev)
    output_dict["flow_b_s"] = upsample_outputs_as(sceneflows_b_s[::-1], shapes_rev)
    output_dict["flow_b_d"] = upsample_outputs_as(sceneflows_b_d[::-1], shapes_rev)
    output_dict["disp_l1_s"] = upsample_outputs_as(disps_l1_s[::-1], shapes_rev)
    output_dict["disp_l1_d"] = upsample_outputs_as(disps_l1_d[::-1], shapes_rev)
    output_dict["disp_l2_s"] = upsample_outputs_as(disps_l2_s[::-1], shapes_rev)
    output_dict["disp_l2_d"] = upsample_outputs_as(disps_l2_d[::-1], shapes_rev)
    output_dict["rigidity_f"] = upsample_outputs_as(rigidity_masks_f[::-1], shapes_rev)
    output_dict["rigidity_b"] = upsample_outputs_as(rigidity_masks_b[::-1], shapes_rev)
    output_dict["cms_f"] = cam_motions_f[::-1]
    output_dict["cms_b"] = cam_motions_b[::-1]
    return output_dict


def forward(params, input_dict, training=False, finetuning=True, evaluation=False):
    output_dict = run_pwc(
        params, input_dict,
        input_dict["input_l1_aug"], input_dict["input_l2_aug"],
        input_dict["input_r1_aug"], input_dict["input_r2_aug"],
        input_dict["input_k_l1_aug"], input_dict["input_k_l2_aug"],
        input_dict["input_k_r1_aug"], input_dict["input_k_r2_aug"])

    if training or (not finetuning and not evaluation):
        input_r1_flip = jnp.flip(input_dict["input_r1_aug"], axis=3)
        input_r2_flip = jnp.flip(input_dict["input_r2_aug"], axis=3)
        k_r1_flip = input_dict["input_k_r1_flip_aug"]
        k_r2_flip = input_dict["input_k_r2_flip_aug"]
        input_l1_flip = jnp.flip(input_dict["input_l1_aug"], axis=3)
        input_l2_flip = jnp.flip(input_dict["input_l2_aug"], axis=3)
        k_l1_flip = input_dict["input_k_l1_flip_aug"]
        k_l2_flip = input_dict["input_k_l2_flip_aug"]
        output_dict_r = run_pwc(params, input_dict, input_l1_flip, input_l2_flip,
                                input_r1_flip, input_r2_flip,
                                k_l1_flip, k_l2_flip, k_r1_flip, k_r2_flip)
        for ii in range(len(output_dict_r["flow_f_s"])):
            output_dict_r["flow_f_s"][ii] = flow_horizontal_flip(output_dict_r["flow_f_s"][ii])
            output_dict_r["flow_f_d"][ii] = flow_horizontal_flip(output_dict_r["flow_f_d"][ii])
            output_dict_r["flow_b_s"][ii] = flow_horizontal_flip(output_dict_r["flow_b_s"][ii])
            output_dict_r["flow_b_d"][ii] = flow_horizontal_flip(output_dict_r["flow_b_d"][ii])
            output_dict_r["disp_l1_s"][ii] = jnp.flip(output_dict_r["disp_l1_s"][ii], axis=3)
            output_dict_r["disp_l1_d"][ii] = jnp.flip(output_dict_r["disp_l1_d"][ii], axis=3)
            output_dict_r["disp_l2_s"][ii] = jnp.flip(output_dict_r["disp_l2_s"][ii], axis=3)
            output_dict_r["disp_l2_d"][ii] = jnp.flip(output_dict_r["disp_l2_d"][ii], axis=3)
            output_dict_r["rigidity_f"][ii] = jnp.flip(output_dict_r["rigidity_f"][ii], axis=3)
            output_dict_r["rigidity_b"][ii] = jnp.flip(output_dict_r["rigidity_b"][ii], axis=3)
            output_dict_r["cms_f"][ii] = cm_horizontal_flip(output_dict_r["cms_f"][ii])
            output_dict_r["cms_b"][ii] = cm_horizontal_flip(output_dict_r["cms_b"][ii])
        output_dict["output_dict_r"] = output_dict_r

    # TODO(synk): the reference eval/finetuning post-processing branch calls run_pwc with the
    # wrong arity and reads output keys that are never produced (upstream bug); not implemented.
    return output_dict


# -----------------------------------------------------------------------------
# Main
# -----------------------------------------------------------------------------
def conv2d_nchw(x, w, b, stride=1, dilation=1, act="none"):
    """NCHW test wrapper around the NHWC Pallas conv (for self-checks)."""
    y = conv2d_nhwc(to_nhwc(x), w, b, stride=stride, dilation=dilation,
                    act=act, out_dtype=jnp.float32)
    return to_nchw(y)


def correlation_ref_nchw(x1, x2, md=SEARCH_RANGE):
    B, C, H, W = x1.shape
    x2p = jnp.pad(x2, ((0, 0), (0, 0), (md, md), (md, md)))
    outs = []
    for di in range(2 * md + 1):
        for dj in range(2 * md + 1):
            r = jnp.mean(x1 * x2p[:, :, di:di + H, dj:dj + W], axis=1)
            outs.append(jnp.where(r >= 0, r, LEAKY_SLOPE * r))
    return jnp.stack(outs, axis=1)


def make_intrinsics(B, H, W):
    k = jnp.array([[0.8 * W, 0.0, W / 2.0],
                   [0.0, 0.8 * W, H / 2.0],
                   [0.0, 0.0, 1.0]], jnp.float32)
    return jnp.broadcast_to(k, (B, 3, 3))


def flip_intrinsics(k, W):
    return k.at[:, 0, 2].set(W - k[:, 0, 2])


if __name__ == "__main__":
    B, H, W = 1, 64, 64   # H, W divisible by 64 (6 stride-2 pyramid levels)

    # --- quick correctness checks of the Pallas convs against XLA's conv ---
    kc = jax.random.PRNGKey(123)
    xc = jax.random.normal(kc, (2, 4, 16, 16), jnp.float32)
    wc = jax.random.normal(jax.random.fold_in(kc, 1), (8, 4, 3, 3), jnp.float32) * 0.1
    bc = jax.random.normal(jax.random.fold_in(kc, 2), (8,), jnp.float32) * 0.1

    got = conv2d_nchw(xc, wc, bc, stride=1)
    ref = lax.conv_general_dilated(xc, wc, (1, 1), ((1, 1), (1, 1)),
                                   dimension_numbers=("NCHW", "OIHW", "NCHW"))
    ref = ref + bc.reshape(1, -1, 1, 1)
    np.testing.assert_allclose(np.asarray(got), np.asarray(ref), rtol=5e-2, atol=5e-2)

    got = conv2d_nchw(xc, wc, bc, stride=2)
    ref = lax.conv_general_dilated(xc, wc, (2, 2), ((1, 1), (1, 1)),
                                   dimension_numbers=("NCHW", "OIHW", "NCHW"))
    ref = ref + bc.reshape(1, -1, 1, 1)
    np.testing.assert_allclose(np.asarray(got), np.asarray(ref), rtol=5e-2, atol=5e-2)

    got = conv2d_nchw(xc, wc, bc, stride=1, dilation=2)
    ref = lax.conv_general_dilated(xc, wc, (1, 1), ((2, 2), (2, 2)),
                                   rhs_dilation=(2, 2),
                                   dimension_numbers=("NCHW", "OIHW", "NCHW"))
    ref = ref + bc.reshape(1, -1, 1, 1)
    np.testing.assert_allclose(np.asarray(got), np.asarray(ref), rtol=5e-2, atol=5e-2)

    # --- correlation self-check ---
    kr = jax.random.PRNGKey(321)
    c1 = jax.random.normal(kr, (2, 8, 6, 7), jnp.float32)
    c2 = jax.random.normal(jax.random.fold_in(kr, 1), (2, 8, 6, 7), jnp.float32)
    got = jnp.transpose(correlation_leaky(to_nhwc(c1), to_nhwc(c2)),
                        (0, 3, 1, 2)).astype(jnp.float32)
    ref = correlation_ref_nchw(c1, c2)
    np.testing.assert_allclose(np.asarray(got), np.asarray(ref), rtol=5e-2, atol=5e-2)

    # --- full model ---
    key = jax.random.PRNGKey(0)
    ks = jax.random.split(key, 4)
    k_l = make_intrinsics(B, H, W)
    input_dict = {
        "input_l1_aug": jax.random.normal(ks[0], (B, 3, H, W), jnp.float32),
        "input_l2_aug": jax.random.normal(ks[1], (B, 3, H, W), jnp.float32),
        "input_r1_aug": jax.random.normal(ks[2], (B, 3, H, W), jnp.float32),
        "input_r2_aug": jax.random.normal(ks[3], (B, 3, H, W), jnp.float32),
        "input_k_l1_aug": k_l, "input_k_l2_aug": k_l,
        "input_k_r1_aug": k_l, "input_k_r2_aug": k_l,
        "input_k_l1_flip_aug": flip_intrinsics(k_l, W),
        "input_k_l2_flip_aug": flip_intrinsics(k_l, W),
        "input_k_r1_flip_aug": flip_intrinsics(k_l, W),
        "input_k_r2_flip_aug": flip_intrinsics(k_l, W),
        "aug_size": jnp.array([[float(H), float(W)]] * B, jnp.float32),
    }

    params = build_params(seed=0)

    # args equivalent: eval-mode + finetuning=True => single run_pwc pass.
    fwd = jax.jit(lambda prm, inp: forward(prm, inp, training=False,
                                           finetuning=True, evaluation=False))
    out = fwd(params, input_dict)
    out = jax.block_until_ready(out)

    # basic shape sanity on the finest-scale outputs
    assert out["flow_f_s"][0].shape == (B, 3, H, W)
    assert out["disp_l1_s"][0].shape == (B, 1, H, W)
    assert out["rigidity_f"][0].shape == (B, 1, H, W)
    assert out["cms_f"][0].shape == (B, 6)
    print("KERNEL_OK")
</pallas_src>

<mosaic_0001>
module attributes {stable_mosaic.version = 11 : i64} {
  func.func @_conv_flat_kernel(%arg0: i32, %arg1: i32, %arg2: memref<1x320x4xbf16, #tpu.memory_space<vmem>>, %arg3: memref<1x40x4xbf16, #tpu.memory_space<vmem>>, %arg4: memref<9x4x8xbf16, #tpu.memory_space<vmem>>, %arg5: memref<1x8xf32, #tpu.memory_space<vmem>>, %arg6: memref<1x320x8xf32, #tpu.memory_space<vmem>>) attributes {dimension_semantics = [#tpu.dimension_semantics<parallel>, #tpu.dimension_semantics<parallel>], iteration_bounds = array<i64: 2, 1>, scalar_prefetch = 0 : i64, scratch_operands = 0 : i64, tpu.core_type = #tpu.core_type<tc>, window_params = [{transform_indices = @transform_0, window_bounds = array<i64: 1, 320, 4>}, {transform_indices = @transform_1, window_bounds = array<i64: 1, 40, 4>}, {pipeline_mode = #tpu.pipeline_mode<synchronous>, transform_indices = @transform_2, window_bounds = array<i64: 9, 4, 8>}, {pipeline_mode = #tpu.pipeline_mode<synchronous>, transform_indices = @transform_3, window_bounds = array<i64: 1, 8>}, {transform_indices = @transform_4, window_bounds = array<i64: 1, 320, 8>}]} {
    %c0 = arith.constant 0 : index
    %c0_0 = arith.constant 0 : index
    %c0_1 = arith.constant 0 : index
    %0 = vector.load %arg2[%c0, %c0_0, %c0_1] : memref<1x320x4xbf16, #tpu.memory_space<vmem>>, vector<1x320x4xbf16>
    %1 = vector.shape_cast %0 : vector<1x320x4xbf16> to vector<320x4xbf16>
    %c0_2 = arith.constant 0 : index
    %c0_3 = arith.constant 0 : index
    %c0_4 = arith.constant 0 : index
    %2 = vector.load %arg3[%c0_2, %c0_3, %c0_4] : memref<1x40x4xbf16, #tpu.memory_space<vmem>>, vector<1x40x4xbf16>
    %3 = vector.shape_cast %2 : vector<1x40x4xbf16> to vector<40x4xbf16>
    %4 = tpu.concatenate %1, %3 in 0 : vector<320x4xbf16>, vector<40x4xbf16> -> vector<360x4xbf16>
    %5 = vector.extract_strided_slice %4 {offsets = [0, 0], sizes = [320, 4], strides = [1, 1]} : vector<360x4xbf16> to vector<320x4xbf16>
    %c0_5 = arith.constant 0 : index
    %c0_6 = arith.constant 0 : index
    %c0_7 = arith.constant 0 : index
    %6 = vector.load %arg4[%c0_5, %c0_6, %c0_7] : memref<9x4x8xbf16, #tpu.memory_space<vmem>>, vector<1x4x8xbf16>
    %7 = vector.shape_cast %6 : vector<1x4x8xbf16> to vector<4x8xbf16>
    %cst = arith.constant dense<0.000000e+00> : vector<320x8xf32>
    %8 = tpu.matmul %5, %7, %cst {dimension_numbers = #tpu.dot_dimension_numbers<[1], [0], [0], [1], [0, 0, 1, 1], [], []>} : vector<320x4xbf16>, vector<4x8xbf16>, vector<320x8xf32> -> vector<320x8xf32>
    %9 = vector.extract_strided_slice %4 {offsets = [1, 0], sizes = [320, 4], strides = [1, 1]} : vector<360x4xbf16> to vector<320x4xbf16>
    %c1 = arith.constant 1 : index
    %c0_8 = arith.constant 0 : index
    %c0_9 = arith.constant 0 : index
    %10 = vector.load %arg4[%c1, %c0_8, %c0_9] : memref<9x4x8xbf16, #tpu.memory_space<vmem>>, vector<1x4x8xbf16>
    %11 = vector.shape_cast %10 : vector<1x4x8xbf16> to vector<4x8xbf16>
    %cst_10 = arith.constant dense<0.000000e+00> : vector<320x8xf32>
    %12 = tpu.matmul %9, %11, %cst_10 {dimension_numbers = #tpu.dot_dimension_numbers<[1], [0], [0], [1], [0, 0, 1, 1], [], []>} : vector<320x4xbf16>, vector<4x8xbf16>, vector<320x8xf32> -> vector<320x8xf32>
    %13 = arith.addf %8, %12 : vector<320x8xf32>
    %14 = vector.extract_strided_slice %4 {offsets = [2, 0], sizes = [320, 4], strides = [1, 1]} : vector<360x4xbf16> to vector<320x4xbf16>
    %c2 = arith.constant 2 : index
    %c0_11 = arith.constant 0 : index
    %c0_12 = arith.constant 0 : index
    %15 = vector.load %arg4[%c2, %c0_11, %c0_12] : memref<9x4x8xbf16, #tpu.memory_space<vmem>>, vector<1x4x8xbf16>
    %16 = vector.shape_cast %15 : vector<1x4x8xbf16> to vector<4x8xbf16>
    %cst_13 = arith.constant dense<0.000000e+00> : vector<320x8xf32>
    %17 = tpu.matmul %14, %16, %cst_13 {dimension_numbers = #tpu.dot_dimension_numbers<[1], [0], [0], [1], [0, 0, 1, 1], [], []>} : vector<320x4xbf16>, vector<4x8xbf16>, vector<320x8xf32> -> vector<320x8xf32>
    %18 = arith.addf %13, %17 : vector<320x8xf32>
    %19 = vector.extract_strided_slice %4 {offsets = [18, 0], sizes = [320, 4], strides = [1, 1]} : vector<360x4xbf16> to vector<320x4xbf16>
    %c3 = arith.constant 3 : index
    %c0_14 = arith.constant 0 : index
    %c0_15 = arith.constant 0 : index
    %20 = vector.load %arg4[%c3, %c0_14, %c0_15] : memref<9x4x8xbf16, #tpu.memory_space<vmem>>, vector<1x4x8xbf16>
    %21 = vector.shape_cast %20 : vector<1x4x8xbf16> to vector<4x8xbf16>
    %cst_16 = arith.constant dense<0.000000e+00> : vector<320x8xf32>
    %22 = tpu.matmul %19, %21, %cst_16 {dimension_numbers = #tpu.dot_dimension_numbers<[1], [0], [0], [1], [0, 0, 1, 1], [], []>} : vector<320x4xbf16>, vector<4x8xbf16>, vector<320x8xf32> -> vector<320x8xf32>
    %23 = arith.addf %18, %22 : vector<320x8xf32>
    %24 = vector.extract_strided_slice %4 {offsets = [19, 0], sizes = [320, 4], strides = [1, 1]} : vector<360x4xbf16> to vector<320x4xbf16>
    %c4 = arith.constant 4 : index
    %c0_17 = arith.constant 0 : index
    %c0_18 = arith.constant 0 : index
    %25 = vector.load %arg4[%c4, %c0_17, %c0_18] : memref<9x4x8xbf16, #tpu.memory_space<vmem>>, vector<1x4x8xbf16>
    %26 = vector.shape_cast %25 : vector<1x4x8xbf16> to vector<4x8xbf16>
    %cst_19 = arith.constant dense<0.000000e+00> : vector<320x8xf32>
    %27 = tpu.matmul %24, %26, %cst_19 {dimension_numbers = #tpu.dot_dimension_numbers<[1], [0], [0], [1], [0, 0, 1, 1], [], []>} : vector<320x4xbf16>, vector<4x8xbf16>, vector<320x8xf32> -> vector<320x8xf32>
    %28 = arith.addf %23, %27 : vector<320x8xf32>
    %29 = vector.extract_strided_slice %4 {offsets = [20, 0], sizes = [320, 4], strides = [1, 1]} : vector<360x4xbf16> to vector<320x4xbf16>
    %c5 = arith.constant 5 : index
    %c0_20 = arith.constant 0 : index
    %c0_21 = arith.constant 0 : index
    %30 = vector.load %arg4[%c5, %c0_20, %c0_21] : memref<9x4x8xbf16, #tpu.memory_space<vmem>>, vector<1x4x8xbf16>
    %31 = vector.shape_cast %30 : vector<1x4x8xbf16> to vector<4x8xbf16>
    %cst_22 = arith.constant dense<0.000000e+00> : vector<320x8xf32>
    %32 = tpu.matmul %29, %31, %cst_22 {dimension_numbers = #tpu.dot_dimension_numbers<[1], [0], [0], [1], [0, 0, 1, 1], [], []>} : vector<320x4xbf16>, vector<4x8xbf16>, vector<320x8xf32> -> vector<320x8xf32>
    %33 = arith.addf %28, %32 : vector<320x8xf32>
    %34 = vector.extract_strided_slice %4 {offsets = [36, 0], sizes = [320, 4], strides = [1, 1]} : vector<360x4xbf16> to vector<320x4xbf16>
    %c6 = arith.constant 6 : index
    %c0_23 = arith.constant 0 : index
    %c0_24 = arith.constant 0 : index
    %35 = vector.load %arg4[%c6, %c0_23, %c0_24] : memref<9x4x8xbf16, #tpu.memory_space<vmem>>, vector<1x4x8xbf16>
    %36 = vector.shape_cast %35 : vector<1x4x8xbf16> to vector<4x8xbf16>
    %cst_25 = arith.constant dense<0.000000e+00> : vector<320x8xf32>
    %37 = tpu.matmul %34, %36, %cst_25 {dimension_numbers = #tpu.dot_dimension_numbers<[1], [0], [0], [1], [0, 0, 1, 1], [], []>} : vector<320x4xbf16>, vector<4x8xbf16>, vector<320x8xf32> -> vector<320x8xf32>
    %38 = arith.addf %33, %37 : vector<320x8xf32>
    %39 = vector.extract_strided_slice %4 {offsets = [37, 0], sizes = [320, 4], strides = [1, 1]} : vector<360x4xbf16> to vector<320x4xbf16>
    %c7 = arith.constant 7 : index
    %c0_26 = arith.constant 0 : index
    %c0_27 = arith.constant 0 : index
    %40 = vector.load %arg4[%c7, %c0_26, %c0_27] : memref<9x4x8xbf16, #tpu.memory_space<vmem>>, vector<1x4x8xbf16>
    %41 = vector.shape_cast %40 : vector<1x4x8xbf16> to vector<4x8xbf16>
    %cst_28 = arith.constant dense<0.000000e+00> : vector<320x8xf32>
    %42 = tpu.matmul %39, %41, %cst_28 {dimension_numbers = #tpu.dot_dimension_numbers<[1], [0], [0], [1], [0, 0, 1, 1], [], []>} : vector<320x4xbf16>, vector<4x8xbf16>, vector<320x8xf32> -> vector<320x8xf32>
    %43 = arith.addf %38, %42 : vector<320x8xf32>
    %44 = vector.extract_strided_slice %4 {offsets = [38, 0], sizes = [320, 4], strides = [1, 1]} : vector<360x4xbf16> to vector<320x4xbf16>
    %c8 = arith.constant 8 : index
    %c0_29 = arith.constant 0 : index
    %c0_30 = arith.constant 0 : index
    %45 = vector.load %arg4[%c8, %c0_29, %c0_30] : memref<9x4x8xbf16, #tpu.memory_space<vmem>>, vector<1x4x8xbf16>
    %46 = vector.shape_cast %45 : vector<1x4x8xbf16> to vector<4x8xbf16>
    %cst_31 = arith.constant dense<0.000000e+00> : vector<320x8xf32>
    %47 = tpu.matmul %44, %46, %cst_31 {dimension_numbers = #tpu.dot_dimension_numbers<[1], [0], [0], [1], [0, 0, 1, 1], [], []>} : vector<320x4xbf16>, vector<4x8xbf16>, vector<320x8xf32> -> vector<320x8xf32>
    %48 = arith.addf %43, %47 : vector<320x8xf32>
    %c0_32 = arith.constant 0 : index
    %c0_33 = arith.constant 0 : index
    %49 = vector.load %arg5[%c0_32, %c0_33] : memref<1x8xf32, #tpu.memory_space<vmem>>, vector<1x8xf32>
    %50 = vector.broadcast %49 : vector<1x8xf32> to vector<320x8xf32>
    %51 = arith.addf %48, %50 : vector<320x8xf32>
    %c0_34 = arith.constant 0 : index
    %c0_35 = arith.constant 0 : index
    %c0_36 = arith.constant 0 : index
    %52 = vector.load %arg6[%c0_34, %c0_35, %c0_36] : memref<1x320x8xf32, #tpu.memory_space<vmem>>, vector<1x320x8xf32>
    %53 = vector.shape_cast %52 : vector<1x320x8xf32> to vector<320x8xf32>
    %54 = vector.shape_cast %51 : vector<320x8xf32> to vector<1x320x8xf32>
    tpu.vector_store %arg6[%c0_34, %c0_35, %c0_36], %54 {strides = array<i32>} : memref<1x320x8xf32, #tpu.memory_space<vmem>>, vector<1x320x8xf32>,
    return
  }
  func.func @transform_0(%arg0: i32, %arg1: i32) -> (i32, i32, i32) {
    %c0_i32 = arith.constant 0 : i32
    %c0_i32_0 = arith.constant 0 : i32
    return %arg0, %arg1, %c0_i32 : i32, i32, i32
  }
  func.func @transform_1(%arg0: i32, %arg1: i32) -> (i32, i32, i32) {
    %c1_i32 = arith.constant 1 : i32
    %0 = arith.addi %arg1, %c1_i32 : i32
    %c8_i32 = arith.constant 8 : i32
    %1 = arith.muli %0, %c8_i32 : i32
    %c0_i32 = arith.constant 0 : i32
    %c0_i32_0 = arith.constant 0 : i32
    return %arg0, %1, %c0_i32 : i32, i32, i32
  }
  func.func @transform_2(%arg0: i32, %arg1: i32) -> (i32, i32, i32) {
    %c0_i32 = arith.constant 0 : i32
    %c0_i32_0 = arith.constant 0 : i32
    %c0_i32_1 = arith.constant 0 : i32
    %c0_i32_2 = arith.constant 0 : i32
    return %c0_i32, %c0_i32_0, %c0_i32_1 : i32, i32, i32
  }
  func.func @transform_3(%arg0: i32, %arg1: i32) -> (i32, i32) {
    %c0_i32 = arith.constant 0 : i32
    %c0_i32_0 = arith.constant 0 : i32
    %c0_i32_1 = arith.constant 0 : i32
    return %c0_i32, %c0_i32_0 : i32, i32
  }
  func.func @transform_4(%arg0: i32, %arg1: i32) -> (i32, i32, i32) {
    %c0_i32 = arith.constant 0 : i32
    %c0_i32_0 = arith.constant 0 : i32
    return %arg0, %arg1, %c0_i32 : i32, i32, i32
  }
}

</mosaic_0001>

<bundles_post_ra>
// kernel: tpu_custom_call.1
= control target key start
LH: loop header
LB: loop body
LE: loop exit
PB: predicated region body
PF: predicated region fallthrough
CT: control target
= control target key end

     0   :  { %s4831_s15 = smov 0   ;;  %s4833_s16 = smov 0   ;;  %s5961_s0 = inlined_call_operand.vmem [shape: bf16[2,360,4], index: 0, kind: input, shape index: {}]   ;;  %s5962_s1 = inlined_call_operand.vmem [shape: bf16[2,360,4], index: 1, kind: input, shape index: {}]   ;;  %s5963_s2 = inlined_call_operand.vmem [shape: bf16[9,4,8], index: 2, kind: input, shape index: {}]   ;;  %s5964_s3 = inlined_call_operand.vmem [shape: f32[1,8], index: 3, kind: input, shape index: {}]   ;;  %s5965_s4 = inlined_call_operand.vmem [shape: f32[2,320,8], index: 4, kind: output, shape index: {}]  }
   0x1   :  { %s4835_s17 = smov 0  }
   0x2 LB: > { %s26_s18 = sadd.s32 1, %s4800_s16  ;;  %p3607_p0 = scmp.ge.s32.totalorder %s4804_s17, 1  ;;  %s4804_s17 = sphi %s4835_s17, %s14_s17   ;;  %s4800_s16 = sphi %s4833_s16, %s6062_s16   ;;  %s4796_s15 = sphi %s4831_s15, %s6061_s15  }
   0x3   : > { %p28_p1 = scmp.ge.s32.totalorder %s26_s18, 2  ;;  %p216_p2 = scmp.lt.s32.totalorder %s4804_s17, 3 }
   0x5   : > { %s6064_s18 = smov (%p28_p1, %s26_s18), 0  ;;  %p217_p3 = pnand %p3607_p0, %p216_p2 }
   0x7   : > { %220 = sbr.rel (%p217_p3) target bundleno = 603 (0x25b), region = 36 }
   0xe   : > { %v3634_v0 = vld [vmem:[%s5963_s2 + $0x2] sm:$0x3]  ;;  %vm695_vm0 = vcmask 1041408   ;;  %v4855_v1 = vld [vmem:[%s5963_s2 + $0x8] sm:$0x3]  ;;  %p270_p4 = scmp.lt.s32.totalorder %s4796_s15, 1 }
   0xf   : > { %4716 = vmatprep.subr.msk.bf16.mxu1 %vm695_vm0, %v3634_v0  ;;  %4720 = vmatprep.subr.msk.bf16.mxu0 %vm695_vm0, %v4855_v1  ;;  %v697_v2 = vsel %vm695_vm0, %v3634_v0, 0  ;;  %v4863_v3 = vsel %vm695_vm0, %v4855_v1, 0  ;;  %v466_v4 = vld [vmem:[%s5963_s2] sm:$0x3]  ;;  %v3738_v5 = vld [vmem:[%s5963_s2 + $0xa] sm:$0x3] }
  0x10   : > { %6011 = vst [vmem:[#allocation2_spill] sm:$0xff] %v4863_v3  ;;  %4017 = vmatpush3.bf16.msra.mxu1 %v697_v2  ;;  %4185 = vmatpush3.bf16.msra.mxu0 %v4863_v3  ;;  %s6066_s15 = smov (!%p270_p4, %s4796_s15), 1  ;;  %vm469_vm1 = vsmask.f32 7424  ;;  %vm1713_vm2 = vsmask.f32 6400 }
  0x11   : > { %4717 = vmatprep.subr.msk.bf16.mxu1 %vm695_vm0, %v466_v4  ;;  %s4726_s27 = smul.u32 180, %s6066_s15  ;;  %4722 = vmatprep.subr.msk.bf16.mxu0 %vm695_vm0, %v3738_v5  ;;  %vm634_vm3 = vcmask 31744   ;;  %v933_v8 = vsel %vm695_vm0, %v466_v4, 0  ;;  %v2205_v10 = vsel %vm695_vm0, %v3738_v5, 0  ;;  %v4929_v36 = vld [vmem:[%s5963_s2 + $0x4] sm:$0x3] }
  0x12   : > { %v4960_v51 = vld [vmem:[%s5963_s2 + $0xc] sm:$0x3]  ;;  %vm2102_vm4 = vcmask 1045504   ;;  %vm1130_vm5 = vcmask 1046528   ;;  %vm2685_vm6 = vsmask.f32 5376 }
  0x13   : > { %s4882_s30 = scalar_lea.vmem %s5961_s0, %s4726_s27  ;;  %s3826_s9 = sadd.s32 160, %s4726_s27  ;;  %vm3072_vm7 = vcmask 1044480   ;;  %vm3457_vm8 = vcmask 64512  }
  0x14   : > { %v4885_v6 = vld [vmem:[%s4882_s30] sm:$0xff]   ;;  %v4888_v7 = vld [vmem:[%s4882_s30 + $0x8] sm:$0xff]   ;;  %v4892_v9 = vld [vmem:[%s4882_s30 + $0x10] sm:$0xff]   ;;  %s5043_s12 = scalar_lea.vmem %s5962_s1, %s3826_s9  ;;  %s4728_s23 = smul.u32 320, %s6066_s15 }
  0x15   : > { %v471_v11 = vshrl.u32 %v4885_v6, 16  ;;  %v473_v12 = vshll.u32 %v4885_v6, 16  ;;  %v478_v13 = vshll.u32 %v4888_v7, 16  ;;  %v482_v14 = vshrl.u32 %v4888_v7, 16  ;;  %v4906_v17 = vld [vmem:[%s4882_s30 + $0x18] sm:$0xff]   ;;  %v4909_v18 = vld [vmem:[%s4882_s30 + $0x20] sm:$0xff]  }
  0x16   : > { %v4900_v15 = vshll.u32 %v4892_v9, 16  ;;  %v4903_v16 = vshrl.u32 %v4892_v9, 16  ;;  %v4915_v26 = vshll.u32 %v4906_v17, 16  ;;  %v4918_v30 = vshrl.u32 %v4906_v17, 16  ;;  %v4921_v31 = vld [vmem:[%s4882_s30 + $0x28] sm:$0xff]   ;;  %v4938_v41 = vld [vmem:[%s4882_s30 + $0x30] sm:$0xff]   ;;  %s5824_s28 = scalar_lea.vmem %s5965_s4, %s4728_s23 }
  0x17   : > { %v475_v19 = vrot.slane %v473_v12, 1  ;;  %v480_v20 = vrot.slane %v478_v13, 1  ;;  %v1714_v21 = vrot.slane %v482_v14, 1  ;;  %v1715_v22 = vrot.slane %v478_v13, 2  ;;  %v4955_v50 = vld [vmem:[%s4882_s30 + $0x38] sm:$0xff]   ;;  %v4983_v63 = vld [vmem:[%s4882_s30 + $0x40] sm:$0xff]  }
  0x18   : > { %v1717_v23 = vrot.slane %v4903_v16, 1  ;;  %v1718_v24 = vrot.slane %v4900_v15, 2  ;;  %v488_v25 = vrot.slane %v4900_v15, 1  ;;  %v1722_v33 = vrot.slane %v4915_v26, 2  ;;  %v5189_v3 = vld [vmem:[%s4882_s30 + $0x90] sm:$0xff]  }
  0x19   : > { %v476_v27 = vor.u32 %v475_v19, %v471_v11  ;;  %v484_v28 = vor.u32 %v482_v14, %v480_v20  ;;  %v1716_v29 = vor.u32 %v1715_v22, %v1714_v21  ;;  %v496_v35 = vrot.slane %v4915_v26, 1 }
  0x1a   : > { %v1719_v32 = vor.u32 %v1718_v24, %v1717_v23  ;;  %v492_v34 = vor.u32 %v4903_v16, %v488_v25  ;;  %v1721_v39 = vrot.slane %v4918_v30, 1  ;;  %v4935_v40 = vshll.u32 %v4909_v18, 16  ;;  %v5010_v23 = vld [vmem:[%s4882_s30 + $0x48] sm:$0xff]  }
  0x1b   : > { %v481_v37 = vsel %vm469_vm1, %v476_v27, %v480_v20  ;;  %v489_v38 = vsel %vm469_vm1, %v484_v28, %v488_v25  ;;  %v4944_v44 = vshrl.u32 %v4909_v18, 16  ;;  %v500_v45 = vor.u32 %v4918_v30, %v496_v35  ;;  %v5017_v28 = vld [vmem:[%s4882_s30 + $0x50] sm:$0xff]  }
  0x1c   : > { %4018 = vmatprep.mubr.msk.bf16.mxu1 %vm634_vm3, %v481_v37  ;;  %v1720_v42 = vsel %vm1713_vm2, %v1716_v29, %v1719_v32  ;;  %v497_v43 = vsel %vm469_vm1, %v492_v34, %v496_v35  ;;  %v1723_v46 = vor.u32 %v1722_v33, %v1721_v39  ;;  %v1726_v47 = vrot.slane %v4935_v40, 2 }
  0x1d   : > { %4186 = vmatprep.mubr.msk.bf16.mxu0 %vm634_vm3, %v1720_v42  ;;  %4019 = vmatmul.mubr.msk.bf16.vlgmr.msra.gmra.mrb[0].mxu1 %vm634_vm3, %v489_v38  ;;  %v504_v48 = vrot.slane %v4935_v40, 1  ;;  %v4952_v49 = vshll.u32 %v4921_v31, 16  ;;  %v1725_v52 = vrot.slane %v4944_v44, 1  ;;  %v4965_v53 = vshrl.u32 %v4921_v31, 16 }
  0x1e   : > { %4059 = vmatpush3.bf16.msra.mxu1 %v933_v8  ;;  %4022 = vmatprep.mubr.msk.bf16.mxu1 %vm634_vm3, %v497_v43  ;;  %v4968_v54 = vshll.u32 %v4938_v41, 16  ;;  %v4971_v55 = vshrl.u32 %v4938_v41, 16  ;;  %v1724_v56 = vsel %vm1713_vm2, %v1719_v32, %v1723_v46  ;;  %v4987_v2 = vshll.u32 %v4955_v50, 16 }
  0x1f   : > { %v1730_v57 = vrot.slane %v4952_v49, 2  ;;  %v508_v58 = vor.u32 %v4944_v44, %v504_v48  ;;  %4718 = vmatprep.subr.msk.bf16.mxu1 %vm695_vm0, %v4929_v36  ;;  %4187 = vmatmul.mubr.msk.bf16.vlgmr.msra.gmra.mrb[0].mxu0 %vm634_vm3, %v1724_v56  ;;  %v1727_v59 = vor.u32 %v1726_v47, %v1725_v52  ;;  %v1729_v60 = vrot.slane %v4965_v53, 1  ;;  %v5051_v56 = vld [vmem:[%s4882_s30 + $0x58] sm:$0xff]  }
  0x20   : > { %v512_v61 = vrot.slane %v4952_v49, 1  ;;  %v1733_v62 = vrot.slane %v4971_v55, 1  ;;  %4227 = vmatpush3.bf16.msra.mxu0 %v2205_v10  ;;  %v1734_v0 = vrot.slane %v4968_v54, 2  ;;  %v4990_v4 = vshrl.u32 %v4955_v50, 16 }
  0x21   : > { %v1728_v5 = vsel %vm1713_vm2, %v1723_v46, %v1727_v59  ;;  %v505_v8 = vsel %vm469_vm1, %v500_v45, %v504_v48  ;;  %v1731_v11 = vor.u32 %v1730_v57, %v1729_v60  ;;  %4723 = vmatprep.subr.msk.bf16.mxu0 %vm695_vm0, %v4960_v51  ;;  %v520_v13 = vrot.slane %v4968_v54, 1 }
  0x22   : > { %4190 = vmatprep.mubr.msk.bf16.mxu0 %vm634_vm3, %v1728_v5  ;;  %v513_v10 = vsel %vm469_vm1, %v508_v58, %v512_v61  ;;  %v1735_v12 = vor.u32 %v1734_v0, %v1733_v62  ;;  %v5000_v14 = vshll.u32 %v4983_v63, 16  ;;  %v1737_v20 = vrot.slane %v4990_v4, 1 }
  0x23   : > { %v1732_v19 = vsel %vm1713_vm2, %v1727_v59, %v1731_v11  ;;  %v1738_v21 = vrot.slane %v4987_v2, 2  ;;  %v5007_v22 = vshrl.u32 %v4983_v63, 16  ;;  %v516_v25 = vor.u32 %v4965_v53, %v512_v61 }
  0x24   : > { %v1736_v24 = vsel %vm1713_vm2, %v1731_v11, %v1735_v12  ;;  %v1742_v27 = vrot.slane %v5000_v14, 2  ;;  %v524_v29 = vor.u32 %v4971_v55, %v520_v13  ;;  %v528_v32 = vrot.slane %v4987_v2, 1 }
  0x25   : > { %4023 = vmatmul.mubr.msk.bf16.gmra.mrb[4].mxu1 %vm634_vm3, %v505_v8  ;;  %v1741_v33 = vrot.slane %v5007_v22, 1  ;;  %v1739_v34 = vor.u32 %v1738_v21, %v1737_v20  ;;  %v5027_v35 = vshll.u32 %v5010_v23, 16  ;;  %v5030_v37 = vshrl.u32 %v5010_v23, 16 }
  0x26   : > { %4026 = vmatprep.mubr.msk.bf16.mxu1 %vm634_vm3, %v513_v10  ;;  %v521_v38 = vsel %vm469_vm1, %v516_v25, %v520_v13  ;;  %v5034_v42 = vshll.u32 %v5017_v28, 16  ;;  %v5037_v43 = vshrl.u32 %v5017_v28, 16  ;;  %v529_v45 = vsel %vm469_vm1, %v524_v29, %v528_v32 }
  0x27   : > { %4191 = vmatmul.mubr.msk.bf16.gmra.mrb[4].mxu0 %vm634_vm3, %v1732_v19  ;;  %v1743_v39 = vor.u32 %v1742_v27, %v1741_v33  ;;  %v1740_v46 = vsel %vm1713_vm2, %v1735_v12, %v1739_v34  ;;  %v536_v47 = vrot.slane %v5000_v14, 1  ;;  %v1745_v48 = vrot.slane %v5030_v37, 1  ;;  %v5084_v33 = vld [vmem:[%s4882_s30 + $0x68] sm:$0xff]  }
  0x28   : > { %4194 = vmatprep.mubr.msk.bf16.mxu0 %vm634_vm3, %v1736_v24  ;;  %6012 = vst [vmem:[#allocation3_spill] sm:$0xff] %v5034_v42  ;;  %v1746_v52 = vrot.slane %v5027_v35, 2  ;;  %v532_v58 = vor.u32 %v4990_v4, %v528_v32  ;;  %v1749_v59 = vrot.slane %v5037_v43, 1  ;;  %v1750_v60 = vrot.slane %v5034_v42, 2  ;;  %v5076_v24 = vld [vmem:[%s4882_s30 + $0x60] sm:$0xff]  }
  0x29   : > { %v1744_v57 = vsel %vm1713_vm2, %v1739_v34, %v1743_v39  ;;  %v540_v61 = vor.u32 %v5007_v22, %v536_v47  ;;  %v544_v62 = vrot.slane %v5027_v35, 1  ;;  %v5063_v5 = vshll.u32 %v5051_v56, 16 }
  0x2a   : > { %v1747_v0 = vor.u32 %v1746_v52, %v1745_v48  ;;  %v5066_v8 = vshrl.u32 %v5051_v56, 16  ;;  %v537_v11 = vsel %vm469_vm1, %v532_v58, %v536_v47  ;;  %v1751_v10 = vor.u32 %v1750_v60, %v1749_v59  ;;  %v5108_v59 = vld [vmem:[%s4882_s30 + $0x70] sm:$0xff]  }
  0x2b   : > { %6013 = vst [vmem:[#allocation4_spill] sm:$0xff] %v5063_v5  ;;  %v545_v12 = vsel %vm469_vm1, %v540_v61, %v544_v62  ;;  %v552_v19 = vrot.slane %v5034_v42, 1  ;;  %v1754_v21 = vrot.slane %v5063_v5, 2  ;;  %v548_v27 = vor.u32 %v5030_v37, %v544_v62 }
  0x2c   : > { %6014 = vst [vmem:[#allocation5_spill] sm:$0xff] %v5066_v8  ;;  %v1748_v13 = vsel %vm1713_vm2, %v1743_v39, %v1747_v0  ;;  %v1753_v20 = vrot.slane %v5066_v8, 1  ;;  %v1752_v25 = vsel %vm1713_vm2, %v1747_v0, %v1751_v10  ;;  %v560_v32 = vrot.slane %v5063_v5, 1 }
  0x2d   : > { %4027 = vmatmul.mubr.msk.bf16.gmra.mrb[8].mxu1 %vm634_vm3, %v521_v38  ;;  %v556_v29 = vor.u32 %v5037_v43, %v552_v19  ;;  %v5091_v38 = vshll.u32 %v5076_v24, 16  ;;  %v553_v39 = vsel %vm469_vm1, %v548_v27, %v552_v19  ;;  %v5098_v48 = vshrl.u32 %v5076_v24, 16 }
  0x2e   : > { %4030 = vmatprep.mubr.msk.bf16.mxu1 %vm634_vm3, %v529_v45  ;;  %v5088_v34 = vor.u32 %v1754_v21, %v1753_v20  ;;  %v2103_v45 = vrot.slane %v4888_v7, 2  ;;  %v5101_v52 = vshll.u32 %v5084_v33, 16  ;;  %v564_v61 = vor.u32 %v5066_v8, %v560_v32 }
  0x2f   : > { %4195 = vmatmul.mubr.msk.bf16.gmra.mrb[8].mxu0 %vm634_vm3, %v1740_v46  ;;  %6016 = vst [vmem:[#allocation7_spill] sm:$0xff] %v5091_v38  ;;  %v2104_v46 = vrot.slane %v4892_v9, 2  ;;  %v561_v47 = vsel %vm469_vm1, %v556_v29, %v560_v32  ;;  %6017 = vst [vmem:[#allocation8_spill] sm:$0xff] %v5098_v48  ;;  %v568_v58 = vrot.slane %v5091_v38, 1  ;;  %v2108_v19 = vrot.slane %v4909_v18, 2 }
  0x30   : > { %4198 = vmatprep.mubr.msk.bf16.mxu0 %vm634_vm3, %v1744_v57  ;;  %6015 = vst [vmem:[#allocation6_spill] sm:$0xff] %v5088_v34  ;;  %6018 = vst [vmem:[#allocation9_spill] sm:$0xff] %v5101_v52  ;;  %v1756_v57 = vsel %vm1713_vm2, %v1751_v10, %v5088_v34  ;;  %v576_v0 = vrot.slane %v5101_v52, 1  ;;  %v2106_v10 = vrot.slane %v4906_v17, 2  ;;  %v5127_v20 = vshrl.u32 %v5084_v33, 16  ;;  %v5199_v52 = vld [vmem:[%s4882_s30 + $0x98] sm:$0xff]  }
  0x31   : > { %v2105_v60 = vsel %vm2102_vm4, %v2103_v45, %v2104_v46  ;;  %v572_v62 = vor.u32 %v5098_v48, %v568_v58  ;;  %v2448_v45 = vsel %vm695_vm0, %v4960_v51, 0  ;;  %v2110_v51 = vrot.slane %v4921_v31, 2 }
  0x32   : > { %6020 = vst [vmem:[#allocation11_spill] sm:$0xff] %v5127_v20  ;;  %v5138_v29 = vsel %vm2102_vm4, %v2104_v46, %v2106_v10  ;;  %v5154_v46 = vld [vmem:[%s4882_s30 + $0x88] sm:$0xff]  }
  0x33   : > { %v577_v21 = vsel %vm469_vm1, %v572_v62, %v576_v0  ;;  %v5181_v34 = vshll.u32 %v5154_v46, 16 }
  0x35   : > { %4031 = vmatmul.mubr.msk.bf16.gmra.mrb[12].mxu1 %vm634_vm3, %v537_v11  ;;  %v5116_v11 = vld [vmem:[%s4882_s30 + $0x78] sm:$0xff]   ;;  %6026 = vst [vmem:[#allocation17_spill] sm:$0xff] %v5181_v34 }
  0x36   : > { %4034 = vmatprep.mubr.msk.bf16.mxu1 %vm634_vm3, %v545_v12  ;;  %v5122_v12 = vshll.u32 %v5108_v59, 16  ;;  %v5134_v27 = vshll.u32 %v5116_v11, 16 }
  0x37   : > { %4199 = vmatmul.mubr.msk.bf16.gmra.mrb[12].mxu0 %vm634_vm3, %v1748_v13  ;;  %v569_v13 = vsel %vm469_vm1, %v564_v61, %v568_v58  ;;  %v5159_v61 = vld [vmem:[%s5963_s2 + $0xe] sm:$0x3] }
  0x38   : > { %4202 = vmatprep.mubr.msk.bf16.mxu0 %vm634_vm3, %v1752_v25  ;;  %6019 = vst [vmem:[#allocation10_spill] sm:$0xff] %v5122_v12  ;;  %v5131_v25 = vshrl.u32 %v5108_v59, 16  ;;  %6022 = vst [vmem:[#allocation13_spill] sm:$0xff] %v5134_v27  ;;  %v584_v32 = vrot.slane %v5122_v12, 1 }
  0x3a   : > { %6021 = vst [vmem:[#allocation12_spill] sm:$0xff] %v5131_v25  ;;  %v588_v58 = vor.u32 %v5131_v25, %v584_v32  ;;  %v608_v25 = vrot.slane %v5181_v34, 1 }
  0x3d   : > { %4035 = vmatmul.mubr.msk.bf16.gmra.mrb[16].mxu1 %vm634_vm3, %v553_v39  ;;  %v5142_v39 = vld [vmem:[%s4882_s30 + $0x80] sm:$0xff]  }
  0x3e   : > { %4038 = vmatprep.mubr.msk.bf16.mxu1 %vm634_vm3, %v561_v47  ;;  %v5148_v47 = vsel %vm2102_vm4, %v2106_v10, %v2108_v19  ;;  %v5167_v62 = vshll.u32 %v5142_v39, 16  ;;  %v2112_v10 = vrot.slane %v4938_v41, 2 }
  0x3f   : > { %4203 = vmatmul.mubr.msk.bf16.gmra.mrb[16].mxu0 %vm634_vm3, %v1756_v57  ;;  %v580_v57 = vor.u32 %v5127_v20, %v576_v0  ;;  %v5232_v20 = vld [vmem:[%s5043_s12] sm:$0xff]  }
  0x40   : > { %4228 = vmatprep.mubr.msk.bf16.mxu0 %vm634_vm3, %v2105_v60  ;;  %v592_v60 = vrot.slane %v5134_v27, 1  ;;  %6023 = vst [vmem:[#allocation14_spill] sm:$0xff] %v5167_v62  ;;  %v5193_v27 = vsel %vm2102_vm4, %v2110_v51, %v2112_v10  ;;  %6031 = vst [vmem:[#allocation22_spill] sm:$0xff] %v5232_v20 }
  0x41   : > { %v585_v0 = vsel %vm469_vm1, %v580_v57, %v584_v32  ;;  %v5185_v32 = vsel %vm2102_vm4, %v2108_v19, %v2110_v51  ;;  %v600_v57 = vrot.slane %v5167_v62, 1  ;;  %v2114_v19 = vrot.slane %v4955_v50, 2 }
  0x42   : > { %v5207_v51 = vshll.u32 %v5189_v3, 16  ;;  %v5216_v62 = vshrl.u32 %v5189_v3, 16 }
  0x44   : > { %6027 = vst [vmem:[#allocation18_spill] sm:$0xff] %v5207_v51  ;;  %6029 = vst [vmem:[#allocation20_spill] sm:$0xff] %v5216_v62 }
  0x45   : > { %4039 = vmatmul.mubr.msk.bf16.gmra.mrb[20].mxu1 %vm634_vm3, %v569_v13  ;;  %v5172_v13 = vshrl.u32 %v5116_v11, 16 }
  0x46   : > { %4042 = vmatprep.mubr.msk.bf16.mxu1 %vm634_vm3, %v577_v21  ;;  %v593_v21 = vsel %vm469_vm1, %v588_v58, %v592_v60 }
  0x47   : > { %4229 = vmatmul.mubr.msk.bf16.vlgmr.msra.gmra.mrb[0].mxu0 %vm634_vm3, %v5138_v29  ;;  %6024 = vst [vmem:[#allocation15_spill] sm:$0xff] %v5172_v13  ;;  %v596_v58 = vor.u32 %v5172_v13, %v592_v60  ;;  %v5223_v13 = vsel %vm2102_vm4, %v2112_v10, %v2114_v19  ;;  %v2118_v10 = vrot.slane %v5010_v23, 2 }
  0x48   : > { %4269 = vmatpush3.bf16.msra.mxu0 %v2448_v45  ;;  %4232 = vmatprep.mubr.msk.bf16.mxu0 %vm634_vm3, %v5148_v47  ;;  %v5178_v45 = vshrl.u32 %v5142_v39, 16 }
  0x49   : > { %4724 = vmatprep.subr.msk.bf16.mxu0 %vm695_vm0, %v5159_v61  ;;  %v601_v60 = vsel %vm469_vm1, %v596_v58, %v600_v57 }
  0x4a   : > { %6025 = vst [vmem:[#allocation16_spill] sm:$0xff] %v5178_v45  ;;  %v604_v12 = vor.u32 %v5178_v45, %v600_v57  ;;  %v5219_v45 = vshll.u32 %v5199_v52, 16  ;;  %v616_v57 = vrot.slane %v5207_v51, 1  ;;  %v5250_v51 = vshll.u32 %v5232_v20, 16 }
  0x4c   : > { %v609_v34 = vsel %vm469_vm1, %v604_v12, %v608_v25  ;;  %6030 = vst [vmem:[#allocation21_spill] sm:$0xff] %v5219_v45  ;;  %v620_v38 = vor.u32 %v5216_v62, %v616_v57  ;;  %v624_v48 = vrot.slane %v5219_v45, 1  ;;  %6034 = vst [vmem:[#allocation25_spill] sm:$0xff] %v5250_v51  ;;  %v5254_v62 = vld [vmem:[%s5043_s12 + $0x10] ss:$0 sps:$4 sm:$0xff]  }
  0x4d   : > { %4043 = vmatmul.mubr.msk.bf16.gmra.mrb[24].mxu1 %vm634_vm3, %v585_v0  ;;  %v2116_v0 = vrot.slane %v4983_v63, 2  ;;  %6035 = vst [vmem:[#allocation26_spill] sm:$0xff] %v5254_v62 }
  0x4e   : > { %4046 = vmatprep.mubr.msk.bf16.mxu1 %vm634_vm3, %v593_v21  ;;  %v5212_v21 = vshrl.u32 %v5154_v46, 16  ;;  %v625_v45 = vsel %vm469_vm1, %v620_v38, %v624_v48  ;;  %v632_v38 = vrot.slane %v5250_v51, 1  ;;  %v2136_v51 = vrot.slane %v5189_v3, 2 }
  0x4f   : > { %4233 = vmatmul.mubr.msk.bf16.gmra.mrb[4].mxu0 %vm634_vm3, %v5185_v32  ;;  %v5228_v58 = vsel %vm2102_vm4, %v2114_v19, %v2116_v0 }
  0x50   : > { %4236 = vmatprep.mubr.msk.bf16.mxu0 %vm634_vm3, %v5193_v27  ;;  %6028 = vst [vmem:[#allocation19_spill] sm:$0xff] %v5212_v21  ;;  %v612_v12 = vor.u32 %v5212_v21, %v608_v25  ;;  %v2120_v25 = vrot.slane %v5017_v28, 2  ;;  %v5258_v21 = vsel %vm2102_vm4, %v2116_v0, %v2118_v10  ;;  %v2122_v0 = vrot.slane %v5051_v56, 2 }
  0x52   : > { %v617_v19 = vsel %vm469_vm1, %v612_v12, %v616_v57  ;;  %v2442_v57 = vrot.slane %v5254_v62, 2  ;;  %v5264_v12 = vsel %vm2102_vm4, %v2118_v10, %v2120_v25  ;;  %v2124_v10 = vrot.slane %v5076_v24, 2 }
  0x53   : > { %v2134_v62 = vrot.slane %v5154_v46, 2 }
  0x55   : > { %4047 = vmatmul.mubr.msk.bf16.gmra.mrb[28].mxu1 %vm634_vm3, %v601_v60  ;;  %v5247_v60 = vshrl.u32 %v5199_v52, 16 }
  0x56   : > { %4050 = vmatprep.mubr.msk.bf16.mxu1 %vm634_vm3, %v609_v34  ;;  %v5242_v34 = vld [vmem:[%s5043_s12 + $0x8] sm:$0xff]  }
  0x57   : > { %4237 = vmatmul.mubr.msk.bf16.gmra.mrb[8].mxu0 %vm634_vm3, %v5223_v13  ;;  %6032 = vst [vmem:[#allocation23_spill] sm:$0xff] %v5242_v34  ;;  %6033 = vst [vmem:[#allocation24_spill] sm:$0xff] %v5247_v60  ;;  %v2142_v5 = vrot.slane %v5242_v34, 2  ;;  %v628_v8 = vor.u32 %v5247_v60, %v624_v48  ;;  %v5280_v48 = vsel %vm2102_vm4, %v2120_v25, %v2122_v0  ;;  %v1233_v25 = vsel %vm695_vm0, %v4929_v36, 0 }
  0x58   : > { %4240 = vmatprep.mubr.msk.bf16.mxu0 %vm634_vm3, %v5228_v58  ;;  %v2130_v36 = vrot.slane %v5116_v11, 2  ;;  %v2138_v34 = vrot.slane %v5199_v52, 2  ;;  %v2140_v60 = vrot.slane %v5232_v20, 2 }
  0x59   : > { %v5269_v42 = vsel %vm2102_vm4, %v2142_v5, %v2442_v57  ;;  %v2128_v57 = vrot.slane %v5108_v59, 2 }
  0x5a   : > { %v5367_v20 = vsel %vm2102_vm4, %v2140_v60, %v2142_v5  ;;  %v5384_v5 = vld [vmem:[%s5963_s2 + $0x10] sm:$0x3] }
  0x5d   : > { %4051 = vmatmul.mubr.msk.bf16.gmra.mrb[32].mxu1 %vm634_vm3, %v617_v19  ;;  %v5285_v19 = vsel %vm2102_vm4, %v2122_v0, %v2124_v10 }
  0x5e   : > { %4054 = vmatprep.mubr.msk.bf16.mxu1 %vm634_vm3, %v625_v45  ;;  %v633_v45 = vsel %vm469_vm1, %v628_v8, %v632_v38  ;;  %v2126_v8 = vrot.slane %v5084_v33, 2  ;;  %v5298_v38 = vld [vmem:[%s5963_s2 + $0x6] sm:$0x3] }
  0x5f   : > { %4241 = vmatmul.mubr.msk.bf16.gmra.mrb[12].mxu0 %vm634_vm3, %v5258_v21 }
  0x60   : > { %4244 = vmatprep.mubr.msk.bf16.mxu0 %vm634_vm3, %v5264_v12  ;;  %v5303_v0 = vsel %vm2102_vm4, %v2124_v10, %v2126_v8  ;;  %v2132_v10 = vrot.slane %v5142_v39, 2 }
  0x65   : > { %4055 = vmatmul.mubr.msk.bf16.gmra.mrb[36].mxu1 %vm634_vm3, %v633_v45  ;;  %v5308_v45 = vsel %vm2102_vm4, %v2126_v8, %v2128_v57  ;;  %v5326_v8 = vsel %vm2102_vm4, %v2130_v36, %v2132_v10 }
  0x66   : > { %4060 = vmatprep.mubr.msk.bf16.mxu1 %vm634_vm3, %v4885_v6 }
  0x67   : > { %4245 = vmatmul.mubr.msk.bf16.gmra.mrb[16].mxu0 %vm634_vm3, %v5280_v48 }
  0x68   : > { %4248 = vmatprep.mubr.msk.bf16.mxu0 %vm634_vm3, %v5285_v19 }
  0x6d   : > { %4061 = vmatmul.mubr.msk.bf16.vlgmr.msra.gmra.mrb[0].mxu1 %vm634_vm3, %v4888_v7 }
  0x6e   : > { %4101 = vmatpush3.bf16.msra.mxu1 %v1233_v25  ;;  %4064 = vmatprep.mubr.msk.bf16.mxu1 %vm634_vm3, %v4892_v9  ;;  %v5321_v25 = vsel %vm2102_vm4, %v2128_v57, %v2130_v36  ;;  %v5337_v57 = vsel %vm2102_vm4, %v2132_v10, %v2134_v62  ;;  %v5342_v36 = vsel %vm2102_vm4, %v2134_v62, %v2136_v51 }
  0x6f   : > { %4719 = vmatprep.subr.msk.bf16.mxu1 %vm695_vm0, %v5298_v38  ;;  %4249 = vmatmul.mubr.msk.bf16.gmra.mrb[20].mxu0 %vm634_vm3, %v5303_v0  ;;  %v5353_v10 = vsel %vm2102_vm4, %v2136_v51, %v2138_v34  ;;  %v5358_v62 = vsel %vm2102_vm4, %v2138_v34, %v2140_v60  ;;  %v2835_v51 = vsel %vm695_vm0, %v5159_v61, 0  ;;  %v1134_v61 = vrot.slane %v4892_v9, 1 }
  0x70   : > { %4252 = vmatprep.mubr.msk.bf16.mxu0 %vm634_vm3, %v5308_v45  ;;  %v1138_v9 = vrot.slane %v4909_v18, 1  ;;  %v1148_v60 = vrot.slane %v5010_v23, 1 }
  0x75   : > { %4065 = vmatmul.mubr.msk.bf16.gmra.mrb[4].mxu1 %vm634_vm3, %v4906_v17 }
  0x76   : > { %4068 = vmatprep.mubr.msk.bf16.mxu1 %vm634_vm3, %v4909_v18  ;;  %v1144_v18 = vrot.slane %v4955_v50, 1 }
  0x77   : > { %4253 = vmatmul.mubr.msk.bf16.gmra.mrb[24].mxu0 %vm634_vm3, %v5321_v25 }
  0x78   : > { %4256 = vmatprep.mubr.msk.bf16.mxu0 %vm634_vm3, %v5326_v8 }
  0x7d   : > { %4069 = vmatmul.mubr.msk.bf16.gmra.mrb[8].mxu1 %vm634_vm3, %v4921_v31 }
  0x7e   : > { %4072 = vmatprep.mubr.msk.bf16.mxu1 %vm634_vm3, %v4938_v41 }
  0x7f   : > { %4257 = vmatmul.mubr.msk.bf16.gmra.mrb[28].mxu0 %vm634_vm3, %v5337_v57 }
  0x80   : > { %4260 = vmatprep.mubr.msk.bf16.mxu0 %vm634_vm3, %v5342_v36 }
  0x85   : > { %4073 = vmatmul.mubr.msk.bf16.gmra.mrb[12].mxu1 %vm634_vm3, %v4955_v50 }
  0x86   : > { %4076 = vmatprep.mubr.msk.bf16.mxu1 %vm634_vm3, %v4983_v63 }
  0x87   : > { %4261 = vmatmul.mubr.msk.bf16.gmra.mrb[32].mxu0 %vm634_vm3, %v5353_v10 }
  0x88   : > { %4264 = vmatprep.mubr.msk.bf16.mxu0 %vm634_vm3, %v5358_v62 }
  0x8d   : > { %4077 = vmatmul.mubr.msk.bf16.gmra.mrb[16].mxu1 %vm634_vm3, %v5010_v23 }
  0x8e   : > { %4080 = vmatprep.mubr.msk.bf16.mxu1 %vm634_vm3, %v5017_v28 }
  0x8f   : > { %4265 = vmatmul.mubr.msk.bf16.gmra.mrb[36].mxu0 %vm634_vm3, %v5367_v20 }
  0x90   : > { %4270 = vmatprep.mubr.msk.bf16.mxu0 %vm634_vm3, %v5138_v29  ;;  %v1132_v29 = vrot.slane %v4888_v7, 1 }
  0x92   : > { %v5429_v7 = vsel %vm1130_vm5, %v1132_v29, %v1134_v61 }
  0x95   : > { %4081 = vmatmul.mubr.msk.bf16.gmra.mrb[20].mxu1 %vm634_vm3, %v5051_v56 }
  0x96   : > { %4084 = vmatprep.mubr.msk.bf16.mxu1 %vm634_vm3, %v5076_v24 }
  0x97   : > { %4271 = vmatmul.mubr.msk.bf16.vlgmr.msra.gmra.mrb[0].mxu0 %vm634_vm3, %v5148_v47 }
  0x98   : > { %4311 = vmatpush3.bf16.msra.mxu0 %v2835_v51  ;;  %4274 = vmatprep.mubr.msk.bf16.mxu0 %vm634_vm3, %v5185_v32  ;;  %v2698_v51 = vrot.slane %v4952_v49, 3 }
  0x99   : > { %4725 = vmatprep.subr.msk.bf16.mxu0 %vm695_vm0, %v5384_v5 }
  0x9d   : > { %4085 = vmatmul.mubr.msk.bf16.gmra.mrb[24].mxu1 %vm634_vm3, %v5084_v33 }
  0x9e   : > { %4088 = vmatprep.mubr.msk.bf16.mxu1 %vm634_vm3, %v5108_v59 }
  0x9f   : > { %4275 = vmatmul.mubr.msk.bf16.gmra.mrb[4].mxu0 %vm634_vm3, %v5193_v27  ;;  %v1131_v27 = vrot.slane %v4885_v6, 1  ;;  %v1136_v6 = vrot.slane %v4906_v17, 1  ;;  %v1140_v17 = vrot.slane %v4921_v31, 1 }
  0xa0   : > { %4278 = vmatprep.mubr.msk.bf16.mxu0 %vm634_vm3, %v5223_v13  ;;  %v1476_v13 = vsel %vm695_vm0, %v5298_v38, 0  ;;  %v2686_v38 = vrot.slane %v4903_v16, 2 }
  0xa1   : > { %v1133_v47 = vsel %vm1130_vm5, %v1131_v27, %v1132_v29  ;;  %v5434_v32 = vsel %vm1130_vm5, %v1134_v61, %v1136_v6  ;;  %v1156_v27 = vrot.slane %v5084_v33, 1  ;;  %v2702_v61 = vrot.slane %v4968_v54, 3 }
  0xa5   : > { %4089 = vmatmul.mubr.msk.bf16.gmra.mrb[28].mxu1 %vm634_vm3, %v5116_v11 }
  0xa6   : > { %4092 = vmatprep.mubr.msk.bf16.mxu1 %vm634_vm3, %v5142_v39 }
  0xa7   : > { %4279 = vmatmul.mubr.msk.bf16.gmra.mrb[8].mxu0 %vm634_vm3, %v5228_v58  ;;  %v5452_v58 = vsel %vm1130_vm5, %v1138_v9, %v1140_v17 }
  0xa8   : > { %4282 = vmatprep.mubr.msk.bf16.mxu0 %vm634_vm3, %v5258_v21  ;;  %v5449_v21 = vsel %vm1130_vm5, %v1136_v6, %v1138_v9  ;;  %v2705_v9 = vrot.slane %v4990_v4, 2  ;;  %v2709_v4 = vrot.slane %v5007_v22, 2 }
  0xad   : > { %4093 = vmatmul.mubr.msk.bf16.gmra.mrb[32].mxu1 %vm634_vm3, %v5154_v46 }
  0xae   : > { %4096 = vmatprep.mubr.msk.bf16.mxu1 %vm634_vm3, %v5189_v3 }
  0xaf   : > { %4283 = vmatmul.mubr.msk.bf16.gmra.mrb[12].mxu0 %vm634_vm3, %v5264_v12 }
  0xb0   : > { %4286 = vmatprep.mubr.msk.bf16.mxu0 %vm634_vm3, %v5280_v48 }
  0xb5   : > { %4097 = vmatmul.mubr.msk.bf16.gmra.mrb[36].mxu1 %vm634_vm3, %v5199_v52 }
  0xb6   : > { %4102 = vmatprep.mubr.msk.bf16.mxu1 %vm634_vm3, %v1133_v47 }
  0xb7   : > { %4287 = vmatmul.mubr.msk.bf16.gmra.mrb[16].mxu0 %vm634_vm3, %v5285_v19  ;;  %v1150_v19 = vrot.slane %v5017_v28, 1 }
  0xb8   : > { %4290 = vmatprep.mubr.msk.bf16.mxu0 %vm634_vm3, %v5303_v0  ;;  %v2687_v0 = vrot.slane %v4900_v15, 3  ;;  %v2693_v15 = vrot.slane %v4944_v44, 2 }
  0xbd   : > { %4103 = vmatmul.mubr.msk.bf16.vlgmr.msra.gmra.mrb[0].mxu1 %vm634_vm3, %v5429_v7 }
  0xbe   : > { %4143 = vmatpush3.bf16.msra.mxu1 %v1476_v13  ;;  %4106 = vmatprep.mubr.msk.bf16.mxu1 %vm634_vm3, %v5434_v32  ;;  %v1158_v13 = vrot.slane %v5108_v59, 1 }
  0xbf   : > { %4721 = vmatprep.subr.msk.bf16.mxu1 %vm695_vm0, %v4855_v1  ;;  %4291 = vmatmul.mubr.msk.bf16.gmra.mrb[20].mxu0 %vm634_vm3, %v5308_v45  ;;  %v1142_v1 = vrot.slane %v4938_v41, 1  ;;  %v1146_v41 = vrot.slane %v4983_v63, 1  ;;  %v2689_v45 = vrot.slane %v4918_v30, 2 }
  0xc0   : > { %4294 = vmatprep.mubr.msk.bf16.mxu0 %vm634_vm3, %v5321_v25  ;;  %v2690_v25 = vrot.slane %v4915_v26, 3  ;;  %v2694_v26 = vrot.slane %v4935_v40, 3  ;;  %v5543_v54 = vsel %vm1130_vm5, %v1156_v27, %v1158_v13 }
  0xc1   : > { %v5465_v31 = vsel %vm1130_vm5, %v1140_v17, %v1142_v1  ;;  %v5468_v34 = vsel %vm1130_vm5, %v1142_v1, %v1144_v18  ;;  %v5481_v12 = vsel %vm1130_vm5, %v1144_v18, %v1146_v41  ;;  %v5484_v48 = vsel %vm1130_vm5, %v1146_v41, %v1148_v60 }
  0xc2   : > { %v2695_v44 = vor.u32 %v2694_v26, %v2693_v15  ;;  %v2706_v17 = vrot.slane %v4987_v2, 3  ;;  %v1160_v1 = vrot.slane %v5116_v11, 1  ;;  %v2710_v41 = vrot.slane %v5000_v14, 3 }
  0xc3   : > { %v1166_v26 = vrot.slane %v5189_v3, 1 }
  0xc4   : > { %v5546_v18 = vsel %vm1130_vm5, %v1158_v13, %v1160_v1  ;;  %v2711_v22 = vor.u32 %v2710_v41, %v2709_v4 }
  0xc5   : > { %4107 = vmatmul.mubr.msk.bf16.gmra.mrb[4].mxu1 %vm634_vm3, %v5449_v21 }
  0xc6   : > { %4110 = vmatprep.mubr.msk.bf16.mxu1 %vm634_vm3, %v5452_v58 }
  0xc7   : > { %4295 = vmatmul.mubr.msk.bf16.gmra.mrb[24].mxu0 %vm634_vm3, %v5326_v8  ;;  %v1152_v8 = vrot.slane %v5051_v56, 1 }
  0xc8   : > { %4298 = vmatprep.mubr.msk.bf16.mxu0 %vm634_vm3, %v5337_v57  ;;  %v5501_v57 = vsel %vm1130_vm5, %v1148_v60, %v1150_v19 }
  0xc9   : > { %v5504_v16 = vsel %vm1130_vm5, %v1150_v19, %v1152_v8  ;;  %v1162_v19 = vrot.slane %v5142_v39, 1 }
  0xcb   : > { %v5563_v14 = vsel %vm1130_vm5, %v1160_v1, %v1162_v19 }
  0xcd   : > { %4111 = vmatmul.mubr.msk.bf16.gmra.mrb[8].mxu1 %vm634_vm3, %v5465_v31 }
  0xce   : > { %4114 = vmatprep.mubr.msk.bf16.mxu1 %vm634_vm3, %v5468_v34 }
  0xcf   : > { %4299 = vmatmul.mubr.msk.bf16.gmra.mrb[28].mxu0 %vm634_vm3, %v5342_v36  ;;  %v2688_v36 = vor.u32 %v2687_v0, %v2686_v38  ;;  %v2713_v38 = vrot.slane %v5030_v37, 2  ;;  %v2714_v0 = vrot.slane %v5027_v35, 3  ;;  %v2717_v35 = vrot.slane %v5037_v43, 2 }
  0xd0   : > { %4302 = vmatprep.mubr.msk.bf16.mxu0 %vm634_vm3, %v5353_v10  ;;  %v2691_v10 = vor.u32 %v2690_v25, %v2689_v45  ;;  %v1164_v45 = vrot.slane %v5154_v46, 1 }
  0xd1   : > { %v2715_v25 = vor.u32 %v2714_v0, %v2713_v38  ;;  %v6044_v0 = vld [vmem:[#allocation12_spill] sm:$0xff] }
  0xd2   : > { %v2692_v30 = vsel %vm2685_vm6, %v2688_v36, %v2691_v10  ;;  %v2696_v49 = vsel %vm2685_vm6, %v2691_v10, %v2695_v44  ;;  %v6036_v36 = vld [vmem:[#allocation3_spill] sm:$0xff] }
  0xd3   : > { %v2718_v10 = vrot.slane %v6036_v36, 3  ;;  %v2716_v15 = vsel %vm2685_vm6, %v2711_v22, %v2715_v25 }
  0xd5   : > { %4115 = vmatmul.mubr.msk.bf16.gmra.mrb[12].mxu1 %vm634_vm3, %v5481_v12  ;;  %v2719_v43 = vor.u32 %v2718_v10, %v2717_v35  ;;  %v6046_v35 = vld [vmem:[#allocation15_spill] sm:$0xff]  ;;  %v6047_v10 = vld [vmem:[#allocation13_spill] sm:$0xff] }
  0xd6   : > { %4118 = vmatprep.mubr.msk.bf16.mxu1 %vm634_vm3, %v5484_v48  ;;  %v2737_v36 = vrot.slane %v6046_v35, 2 }
  0xd7   : > { %4303 = vmatmul.mubr.msk.bf16.gmra.mrb[32].mxu0 %vm634_vm3, %v5358_v62  ;;  %v2697_v62 = vrot.slane %v4965_v53, 2  ;;  %v3175_v53 = vsel %vm695_vm0, %v5384_v5, 0  ;;  %v2707_v5 = vor.u32 %v2706_v17, %v2705_v9  ;;  %v6041_v17 = vld [vmem:[#allocation22_spill] sm:$0xff] }
  0xd8   : > { %4306 = vmatprep.mubr.msk.bf16.mxu0 %vm634_vm3, %v5367_v20  ;;  %v1154_v20 = vrot.slane %v5076_v24, 1  ;;  %v1170_v1 = vrot.slane %v6041_v17, 1 }
  0xd9   : > { %v2699_v29 = vor.u32 %v2698_v51, %v2697_v62  ;;  %v2712_v37 = vsel %vm2685_vm6, %v2707_v5, %v2711_v22  ;;  %v6038_v62 = vld [vmem:[#allocation4_spill] sm:$0xff]  ;;  %v6045_v22 = vld [vmem:[#allocation10_spill] sm:$0xff] }
  0xda   : > { %v5521_v40 = vsel %vm1130_vm5, %v1152_v8, %v1154_v20  ;;  %v5524_v47 = vsel %vm1130_vm5, %v1154_v20, %v1156_v27  ;;  %v5566_v8 = vsel %vm1130_vm5, %v1162_v19, %v1164_v45  ;;  %v2722_v51 = vrot.slane %v6038_v62, 3  ;;  %v6048_v62 = vld [vmem:[#allocation16_spill] sm:$0xff] }
  0xdb   : > { %v2700_v6 = vsel %vm2685_vm6, %v2695_v44, %v2699_v29  ;;  %v1168_v27 = vrot.slane %v5199_v52, 1  ;;  %v5583_v44 = vsel %vm1130_vm5, %v1164_v45, %v1166_v26  ;;  %v2733_v45 = vrot.slane %v6044_v0, 2 }
  0xdd   : > { %4119 = vmatmul.mubr.msk.bf16.gmra.mrb[16].mxu1 %vm634_vm3, %v5501_v57 }
  0xde   : > { %4122 = vmatprep.mubr.msk.bf16.mxu1 %vm634_vm3, %v5504_v16 }
  0xdf   : > { %4307 = vmatmul.mubr.msk.bf16.gmra.mrb[36].mxu0 %vm634_vm3, %v5269_v42  ;;  %v2701_v42 = vrot.slane %v4971_v55, 2 }
  0xe0   : > { %4312 = vmatprep.mubr.msk.bf16.mxu0 %vm634_vm3, %v2692_v30  ;;  %v6037_v30 = vld [vmem:[#allocation5_spill] sm:$0xff] }
  0xe1   : > { %v2703_v55 = vor.u32 %v2702_v61, %v2701_v42  ;;  %v2721_v20 = vrot.slane %v6037_v30, 2  ;;  %v6039_v42 = vld [vmem:[#allocation8_spill] sm:$0xff] }
  0xe2   : > { %v2725_v61 = vrot.slane %v6039_v42, 2 }
  0xe3   : > { %v2704_v2 = vsel %vm2685_vm6, %v2699_v29, %v2703_v55  ;;  %v2708_v60 = vsel %vm2685_vm6, %v2703_v55, %v2707_v5  ;;  %v2723_v29 = vor.u32 %v2722_v51, %v2721_v20  ;;  %v6042_v55 = vld [vmem:[#allocation11_spill] sm:$0xff]  ;;  %v2741_v51 = vrot.slane %v6048_v62, 2 }
  0xe4   : > { %v2729_v5 = vrot.slane %v6042_v55, 2 }
  0xe5   : > { %4123 = vmatmul.mubr.msk.bf16.gmra.mrb[20].mxu1 %vm634_vm3, %v5521_v40  ;;  %v2724_v9 = vsel %vm2685_vm6, %v2719_v43, %v2723_v29 }
  0xe6   : > { %4126 = vmatprep.mubr.msk.bf16.mxu1 %vm634_vm3, %v5524_v47 }
  0xe7   : > { %4313 = vmatmul.mubr.msk.bf16.vlgmr.msra.gmra.mrb[0].mxu0 %vm634_vm3, %v2696_v49  ;;  %v5586_v49 = vsel %vm1130_vm5, %v1166_v26, %v1168_v27 }
  0xe8   : > { %4353 = vmatpush3.bf16.msra.mxu0 %v3175_v53  ;;  %4316 = vmatprep.mubr.msk.bf16.mxu0 %vm634_vm3, %v2700_v6  ;;  %v2720_v53 = vsel %vm2685_vm6, %v2715_v25, %v2719_v43  ;;  %v6040_v6 = vld [vmem:[#allocation7_spill] sm:$0xff]  ;;  %v2734_v25 = vrot.slane %v6045_v22, 3  ;;  %v6050_v43 = vld [vmem:[#allocation2_spill] sm:$0xff] }
  0xe9   : > { %v2726_v13 = vrot.slane %v6040_v6, 3 }
  0xea   : > { %v2735_v26 = vor.u32 %v2734_v25, %v2733_v45  ;;  %v6055_v25 = vld [vmem:[#allocation24_spill] sm:$0xff] }
  0xeb   : > { %v2727_v41 = vor.u32 %v2726_v13, %v2725_v61  ;;  %v6052_v13 = vld [vmem:[#allocation17_spill] sm:$0xff] }
  0xed   : > { %4127 = vmatmul.mubr.msk.bf16.gmra.mrb[24].mxu1 %vm634_vm3, %v5543_v54  ;;  %v2728_v38 = vsel %vm2685_vm6, %v2723_v29, %v2727_v41 }
  0xee   : > { %4130 = vmatprep.mubr.msk.bf16.mxu1 %vm634_vm3, %v5546_v18 }
  0xef   : > { %4317 = vmatmul.mubr.msk.bf16.gmra.mrb[4].mxu0 %vm634_vm3, %v2704_v2  ;;  %v6043_v2 = vld [vmem:[#allocation9_spill] sm:$0xff] }
  0xf0   : > { %4320 = vmatprep.mubr.msk.bf16.mxu0 %vm634_vm3, %v2708_v60  ;;  %v2730_v4 = vrot.slane %v6043_v2, 3  ;;  %v5604_v60 = vsel %vm1130_vm5, %v1168_v27, %v1170_v1 }
  0xf2   : > { %v2731_v19 = vor.u32 %v2730_v4, %v2729_v5 }
  0xf4   : > { %v2736_v20 = vsel %vm2685_vm6, %v2731_v19, %v2735_v26 }
  0xf5   : > { %4131 = vmatmul.mubr.msk.bf16.gmra.mrb[28].mxu1 %vm634_vm3, %v5563_v14 }
  0xf6   : > { %4134 = vmatprep.mubr.msk.bf16.mxu1 %vm634_vm3, %v5566_v8 }
  0xf7   : > { %4321 = vmatmul.mubr.msk.bf16.gmra.mrb[8].mxu0 %vm634_vm3, %v2712_v37  ;;  %v2732_v37 = vsel %vm2685_vm6, %v2727_v41, %v2731_v19  ;;  %v6053_v41 = vld [vmem:[#allocation20_spill] sm:$0xff] }
  0xf8   : > { %4324 = vmatprep.mubr.msk.bf16.mxu0 %vm634_vm3, %v2716_v15  ;;  %v2738_v15 = vrot.slane %v6047_v10, 3  ;;  %v2749_v19 = vrot.slane %v6053_v41, 2 }
  0xfa   : > { %v2739_v30 = vor.u32 %v2738_v15, %v2737_v36  ;;  %v6056_v36 = vld [vmem:[#allocation21_spill] sm:$0xff] }
  0xfb   : > { %v2754_v15 = vrot.slane %v6056_v36, 3 }
  0xfc   : > { %v2740_v29 = vsel %vm2685_vm6, %v2735_v26, %v2739_v30  ;;  %v1789_v26 = vshrl.u32 %v6041_v17, 16 }
  0xfd   : > { %4135 = vmatmul.mubr.msk.bf16.gmra.mrb[32].mxu1 %vm634_vm3, %v5583_v44 }
  0xfe   : > { %4138 = vmatprep.mubr.msk.bf16.mxu1 %vm634_vm3, %v5586_v49 }
  0xff   : > { %4325 = vmatmul.mubr.msk.bf16.gmra.mrb[12].mxu0 %vm634_vm3, %v2720_v53  ;;  %v6051_v53 = vld [vmem:[#allocation19_spill] sm:$0xff] }
 0x100   : > { %4328 = vmatprep.mubr.msk.bf16.mxu0 %vm634_vm3, %v2724_v9  ;;  %v2745_v61 = vrot.slane %v6051_v53, 2  ;;  %v2746_v9 = vrot.slane %v6052_v13, 3 }
 0x102   : > { %v2747_v5 = vor.u32 %v2746_v9, %v2745_v61 }
 0x105   : > { %4139 = vmatmul.mubr.msk.bf16.gmra.mrb[36].mxu1 %vm634_vm3, %v5604_v60 }
 0x106   : > { %4144 = vmatprep.mubr.msk.bf16.mxu1 %vm634_vm3, %v5429_v7  ;;  %v6049_v7 = vld [vmem:[#allocation14_spill] sm:$0xff] }
 0x107   : > { %4329 = vmatmul.mubr.msk.bf16.gmra.mrb[16].mxu0 %vm634_vm3, %v2728_v38  ;;  %v2742_v27 = vrot.slane %v6049_v7, 3 }
 0x108   : > { %4332 = vmatprep.mubr.msk.bf16.mxu0 %vm634_vm3, %v2732_v37  ;;  %v2753_v37 = vrot.slane %v6055_v25, 2 }
 0x10d   : > { %4145 = vmatmul.mubr.msk.bf16.vlgmr.msra.gmra.mrb[0].mxu1 %vm634_vm3, %v5434_v32  ;;  %v2743_v32 = vor.u32 %v2742_v27, %v2741_v51 }
 0x10e   : > { %4395 = vmatpush3.bf16.msra.mxu1 %v6050_v43  ;;  %4148 = vmatprep.mubr.msk.bf16.mxu1 %vm634_vm3, %v5449_v21  ;;  %v6054_v21 = vld [vmem:[#allocation18_spill] sm:$0xff]  ;;  %v2757_v43 = vrot.slane %v1789_v26, 2 }
 0x10f   : > { %4333 = vmatmul.mubr.msk.bf16.gmra.mrb[20].mxu0 %vm634_vm3, %v2736_v20  ;;  %v2744_v4 = vsel %vm2685_vm6, %v2739_v30, %v2743_v32  ;;  %v2750_v38 = vrot.slane %v6054_v21, 3  ;;  %v2748_v45 = vsel %vm2685_vm6, %v2743_v32, %v2747_v5  ;;  %v2755_v30 = vor.u32 %v2754_v15, %v2753_v37  ;;  %v6057_v20 = vld [vmem:[#allocation23_spill] sm:$0xff] }
 0x110   : > { %4336 = vmatprep.mubr.msk.bf16.mxu0 %vm634_vm3, %v2740_v29  ;;  %v1796_v51 = vshrl.u32 %v6057_v20, 16  ;;  %v1799_v27 = vshll.u32 %v6057_v20, 16  ;;  %v6058_v29 = vld [vmem:[#allocation25_spill] sm:$0xff] }
 0x111   : > { %v2758_v61 = vrot.slane %v6058_v29, 3 }
 0x112   : > { %v2761_v32 = vrot.slane %v1796_v51, 2 }
 0x115   : > { %4149 = vmatmul.mubr.msk.bf16.gmra.mrb[4].mxu1 %vm634_vm3, %v5452_v58  ;;  %v2751_v58 = vor.u32 %v2750_v38, %v2749_v19 }
 0x116   : > { %4152 = vmatprep.mubr.msk.bf16.mxu1 %vm634_vm3, %v5465_v31 }
 0x117   : > { %4337 = vmatmul.mubr.msk.bf16.gmra.mrb[24].mxu0 %vm634_vm3, %v2744_v4  ;;  %v2752_v31 = vsel %vm2685_vm6, %v2747_v5, %v2751_v58  ;;  %v2756_v9 = vsel %vm2685_vm6, %v2751_v58, %v2755_v30  ;;  %v2762_v4 = vrot.slane %v1799_v27, 3  ;;  %v6059_v5 = vld [vmem:[#allocation26_spill] sm:$0xff] }
 0x118   : > { %4340 = vmatprep.mubr.msk.bf16.mxu0 %vm634_vm3, %v2748_v45  ;;  %v2766_v19 = vshrl.u32 %v6059_v5, 16  ;;  %v2769_v38 = vshll.u32 %v6059_v5, 16 }
 0x11a   : > { %v2768_v37 = vrot.slane %v2766_v19, 2  ;;  %v2771_v15 = vrot.slane %v2769_v38, 3  ;;  %v4781_v38 = vld [vmem:[%s4882_s30 + $0x30] sm:$0xff]  }
 0x11d   : > { %4153 = vmatmul.mubr.msk.bf16.gmra.mrb[8].mxu1 %vm634_vm3, %v5468_v34  ;;  %v2759_v34 = vor.u32 %v2758_v61, %v2757_v43  ;;  %v4777_v43 = vld [vmem:[%s4882_s30 + $0x10] sm:$0xff]  }
 0x11e   : > { %4156 = vmatprep.mubr.msk.bf16.mxu1 %vm634_vm3, %v5481_v12  ;;  %v2763_v12 = vor.u32 %v2762_v4, %v2761_v32  ;;  %v3073_v61 = vrot.slane %v4777_v43, 3  ;;  %v4779_v32 = vld [vmem:[%s4882_s30 + $0x20] sm:$0xff]  }
 0x11f   : > { %4341 = vmatmul.mubr.msk.bf16.gmra.mrb[28].mxu0 %vm634_vm3, %v2752_v31  ;;  %v2760_v45 = vsel %vm2685_vm6, %v2755_v30, %v2759_v34  ;;  %v2772_v31 = vor.u32 %v2771_v15, %v2768_v37  ;;  %v3076_v4 = vrot.slane %v4779_v32, 3  ;;  %v3084_v37 = vrot.slane %v4983_v63, 3 }
 0x120   : > { %4344 = vmatprep.mubr.msk.bf16.mxu0 %vm634_vm3, %v2756_v9  ;;  %v2764_v58 = vsel %vm2685_vm6, %v2759_v34, %v2763_v12  ;;  %v4778_v9 = vld [vmem:[%s4882_s30 + $0x18] sm:$0xff]   ;;  %v4780_v34 = vld [vmem:[%s4882_s30 + $0x28] sm:$0xff]   ;;  %v3086_v15 = vrot.slane %v5010_v23, 3  ;;  %v3090_v63 = vrot.slane %v5051_v56, 3  ;;  %v1757_v23 = vrot.slane %v6039_v42, 1 }
 0x121   : > { %v3078_v19 = vrot.slane %v4780_v34, 3  ;;  %v1761_v42 = vrot.slane %v6042_v55, 1  ;;  %v3096_v55 = vrot.slane %v5108_v59, 3  ;;  %v1774_v34 = vrot.slane %v6049_v7, 2 }
 0x122   : > { %v1777_v7 = vrot.slane %v6051_v53, 1  ;;  %v3104_v53 = vrot.slane %v5189_v3, 3 }
 0x125   : > { %4157 = vmatmul.mubr.msk.bf16.gmra.mrb[12].mxu1 %vm634_vm3, %v5484_v48  ;;  %v3074_v48 = vrot.slane %v4778_v9, 3  ;;  %v1765_v9 = vrot.slane %v6044_v0, 1  ;;  %v3098_v0 = vrot.slane %v5116_v11, 3 }
 0x126   : > { %4160 = vmatprep.mubr.msk.bf16.mxu1 %vm634_vm3, %v5501_v57  ;;  %v2773_v57 = vsel %vm2685_vm6, %v2763_v12, %v2772_v31  ;;  %v3080_v12 = vrot.slane %v4781_v38, 3  ;;  %v1470_v31 = vrot.slane %v6057_v20, 1 }
 0x127   : > { %4345 = vmatmul.mubr.msk.bf16.gmra.mrb[32].mxu0 %vm634_vm3, %v2760_v45  ;;  %v3075_v30 = vsel %vm3072_vm7, %v3073_v61, %v3074_v48  ;;  %v3082_v45 = vrot.slane %v4955_v50, 3  ;;  %v3099_v59 = vsel %vm3072_vm7, %v3096_v55, %v3098_v0 }
 0x128   : > { %4348 = vmatprep.mubr.msk.bf16.mxu0 %vm634_vm3, %v2764_v58  ;;  %v1758_v58 = vrot.slane %v6040_v6, 2  ;;  %v1471_v56 = vsel %vm1130_vm5, %v1170_v1, %v1470_v31  ;;  %v1762_v6 = vrot.slane %v6043_v2, 2 }
 0x129   : > { %v3085_v50 = vsel %vm3072_vm7, %v3082_v45, %v3084_v37 }
 0x12a   : > { %v1759_v43 = vor.u32 %v1758_v58, %v1757_v23  ;;  %v1801_v23 = vrot.slane %v1799_v27, 2 }
 0x12d   : > { %4161 = vmatmul.mubr.msk.bf16.gmra.mrb[16].mxu1 %vm634_vm3, %v5504_v16  ;;  %v3077_v16 = vsel %vm3072_vm7, %v3074_v48, %v3076_v4  ;;  %v1766_v48 = vrot.slane %v6045_v22, 2  ;;  %v1769_v22 = vrot.slane %v6046_v35, 1  ;;  %v3100_v35 = vrot.slane %v5142_v39, 3 }
 0x12e   : > { %4164 = vmatprep.mubr.msk.bf16.mxu1 %vm634_vm3, %v5521_v40  ;;  %v3079_v40 = vsel %vm3072_vm7, %v3076_v4, %v3078_v19  ;;  %v1773_v4 = vrot.slane %v6048_v62, 1  ;;  %v3102_v62 = vrot.slane %v5154_v46, 3 }
 0x12f   : > { %4349 = vmatmul.mubr.msk.bf16.gmra.mrb[36].mxu0 %vm634_vm3, %v2773_v57  ;;  %v1767_v57 = vor.u32 %v1766_v48, %v1765_v9 }
 0x130   : > { %4354 = vmatprep.mubr.msk.bf16.mxu0 %vm634_vm3, %v3075_v30  ;;  %v1770_v30 = vrot.slane %v6047_v10, 2  ;;  %v1775_v11 = vor.u32 %v1774_v34, %v1773_v4  ;;  %v3103_v39 = vsel %vm3072_vm7, %v3100_v35, %v3102_v62 }
 0x135   : > { %4165 = vmatmul.mubr.msk.bf16.gmra.mrb[20].mxu1 %vm634_vm3, %v5524_v47  ;;  %v3081_v47 = vsel %vm3072_vm7, %v3078_v19, %v3080_v12 }
 0x136   : > { %4168 = vmatprep.mubr.msk.bf16.mxu1 %vm634_vm3, %v5543_v54  ;;  %v3083_v54 = vsel %vm3072_vm7, %v3080_v12, %v3082_v45  ;;  %v1781_v12 = vrot.slane %v6053_v41, 1  ;;  %v1782_v45 = vrot.slane %v6054_v21, 2  ;;  %v3106_v41 = vrot.slane %v5199_v52, 3 }
 0x137   : > { %4355 = vmatmul.mubr.msk.bf16.vlgmr.msra.gmra.mrb[0].mxu0 %vm634_vm3, %v3077_v16  ;;  %v1771_v16 = vor.u32 %v1770_v30, %v1769_v22  ;;  %v1785_v21 = vrot.slane %v6055_v25, 1  ;;  %v3108_v25 = vrot.slane %v6041_v17, 3 }
 0x138   : > { %4358 = vmatprep.mubr.msk.bf16.mxu0 %vm634_vm3, %v3079_v40  ;;  %v1778_v40 = vrot.slane %v6052_v13, 2  ;;  %v1783_v46 = vor.u32 %v1782_v45, %v1781_v12  ;;  %v3107_v3 = vsel %vm3072_vm7, %v3104_v53, %v3106_v41 }
 0x139   : > { %v1772_v10 = vsel %vm1713_vm2, %v1767_v57, %v1771_v16  ;;  %v1776_v38 = vsel %vm1713_vm2, %v1771_v16, %v1775_v11 }
 0x13d   : > { %4169 = vmatmul.mubr.msk.bf16.gmra.mrb[24].mxu1 %vm634_vm3, %v5546_v18  ;;  %v3087_v18 = vsel %vm3072_vm7, %v3084_v37, %v3086_v15  ;;  %v1786_v37 = vrot.slane %v6056_v36, 2 }
 0x13e   : > { %4172 = vmatprep.mubr.msk.bf16.mxu1 %vm634_vm3, %v5563_v14  ;;  %v3088_v14 = vrot.slane %v5017_v28, 3  ;;  %v3092_v28 = vrot.slane %v5076_v24, 3 }
 0x13f   : > { %4359 = vmatmul.mubr.msk.bf16.gmra.mrb[4].mxu0 %vm634_vm3, %v3081_v47  ;;  %v3101_v47 = vsel %vm3072_vm7, %v3098_v0, %v3100_v35  ;;  %v1787_v52 = vor.u32 %v1786_v37, %v1785_v21 }
 0x140   : > { %4362 = vmatprep.mubr.msk.bf16.mxu0 %vm634_vm3, %v3083_v54  ;;  %v3093_v24 = vsel %vm3072_vm7, %v3090_v63, %v3092_v28  ;;  %v1779_v54 = vor.u32 %v1778_v40, %v1777_v7 }
 0x141   : > { %v1788_v36 = vsel %vm1713_vm2, %v1783_v46, %v1787_v52 }
 0x142   : > { %v1780_v13 = vsel %vm1713_vm2, %v1775_v11, %v1779_v54 }
 0x145   : > { %4173 = vmatmul.mubr.msk.bf16.gmra.mrb[28].mxu1 %vm634_vm3, %v5566_v8  ;;  %v3089_v8 = vsel %vm3072_vm7, %v3086_v15, %v3088_v14  ;;  %v1784_v15 = vsel %vm1713_vm2, %v1779_v54, %v1783_v46 }
 0x146   : > { %4176 = vmatprep.mubr.msk.bf16.mxu1 %vm634_vm3, %v5583_v44  ;;  %v3091_v44 = vsel %vm3072_vm7, %v3088_v14, %v3090_v63  ;;  %v3105_v14 = vsel %vm3072_vm7, %v3102_v62, %v3104_v53 }
 0x147   : > { %4363 = vmatmul.mubr.msk.bf16.gmra.mrb[8].mxu0 %vm634_vm3, %v3085_v50  ;;  %v1791_v50 = vrot.slane %v1789_v26, 1  ;;  %v3110_v26 = vrot.slane %v6057_v20, 3 }
 0x148   : > { %4366 = vmatprep.mubr.msk.bf16.mxu0 %vm634_vm3, %v3087_v18  ;;  %v1792_v18 = vrot.slane %v6058_v29, 2  ;;  %v1798_v29 = vrot.slane %v1796_v51, 1  ;;  %v3112_v51 = vrot.slane %v6059_v5, 3 }
 0x149   : > { %v3111_v17 = vsel %vm3072_vm7, %v3108_v25, %v3110_v26 }
 0x14a   : > { %v1793_v63 = vor.u32 %v1792_v18, %v1791_v50  ;;  %v3113_v27 = vsel %vm3072_vm7, %v3110_v26, %v3112_v51 }
 0x14c   : > { %v1794_v58 = vsel %vm1713_vm2, %v1787_v52, %v1793_v63 }
 0x14d   : > { %4177 = vmatmul.mubr.msk.bf16.gmra.mrb[32].mxu1 %vm634_vm3, %v5586_v49  ;;  %v3094_v49 = vrot.slane %v5084_v33, 3  ;;  %v1763_v33 = vor.u32 %v1762_v6, %v1761_v42 }
 0x14e   : > { %4180 = vmatprep.mubr.msk.bf16.mxu1 %vm634_vm3, %v5604_v60  ;;  %v6060_v60 = vld [vmem:[#allocation6_spill] sm:$0xff] }
 0x14f   : > { %4367 = vmatmul.mubr.msk.bf16.gmra.mrb[12].mxu0 %vm634_vm3, %v3089_v8  ;;  %v1760_v61 = vsel %vm1713_vm2, %v6060_v60, %v1759_v43  ;;  %v3095_v1 = vsel %vm3072_vm7, %v3092_v28, %v3094_v49  ;;  %v1764_v2 = vsel %vm1713_vm2, %v1759_v43, %v1763_v33  ;;  %v1768_v32 = vsel %vm1713_vm2, %v1763_v33, %v1767_v57 }
 0x150   : > { %4370 = vmatprep.mubr.msk.bf16.mxu0 %vm634_vm3, %v3091_v44  ;;  %v3097_v19 = vsel %vm3072_vm7, %v3094_v49, %v3096_v55  ;;  %v3109_v8 = vsel %vm3072_vm7, %v3106_v41, %v3108_v25  ;;  %v1802_v44 = vor.u32 %v1801_v23, %v1798_v29 }
 0x152   : > { %v1803_v20 = vsel %vm1713_vm2, %v1793_v63, %v1802_v44 }
 0x155   : > { %4181 = vmatmul.mubr.msk.bf16.gmra.mrb[36].mxu1 %vm634_vm3, %v1471_v56 }
 0x156   : > { %4206 = vmatprep.mubr.msk.bf16.mxu1 %vm634_vm3, %v1760_v61 }
 0x157   : > { %4371 = vmatmul.mubr.msk.bf16.gmra.mrb[16].mxu0 %vm634_vm3, %v3093_v24 }
 0x158   : > { %4374 = vmatprep.mubr.msk.bf16.mxu0 %vm634_vm3, %v3095_v1 }
 0x15d   : > { %4207 = vmatmul.mubr.msk.bf16.vlgmr.msra.gmra.mrb[20].mxu1 %vm634_vm3, %v1764_v2 }
 0x15e   : > { %4210 = vmatprep.mubr.msk.bf16.mxu1 %vm634_vm3, %v1768_v32  ;;  %v5819_v32 = vld [vmem:[%s5964_s3] ss:$0 sm:$0xff] }
 0x15f   : > { %4375 = vmatmul.mubr.msk.bf16.gmra.mrb[20].mxu0 %vm634_vm3, %v3097_v19 }
 0x160   : > { %4378 = vmatprep.mubr.msk.bf16.mxu0 %vm634_vm3, %v3099_v59 }
 0x165   : > { %4211 = vmatmul.mubr.msk.bf16.gmra.mrb[24].mxu1 %vm634_vm3, %v1772_v10 }
 0x166   : > { %4214 = vmatprep.mubr.msk.bf16.mxu1 %vm634_vm3, %v1776_v38 }
 0x167   : > { %4379 = vmatmul.mubr.msk.bf16.gmra.mrb[24].mxu0 %vm634_vm3, %v3101_v47 }
 0x168   : > { %4382 = vmatprep.mubr.msk.bf16.mxu0 %vm634_vm3, %v3103_v39 }
 0x16d   : > { %4215 = vmatmul.mubr.msk.bf16.gmra.mrb[28].mxu1 %vm634_vm3, %v1780_v13 }
 0x16e   : > { %4218 = vmatprep.mubr.msk.bf16.mxu1 %vm634_vm3, %v1784_v15 }
 0x16f   : > { %4383 = vmatmul.mubr.msk.bf16.gmra.mrb[28].mxu0 %vm634_vm3, %v3105_v14 }
 0x170   : > { %4386 = vmatprep.mubr.msk.bf16.mxu0 %vm634_vm3, %v3107_v3 }
 0x175   : > { %4219 = vmatmul.mubr.msk.bf16.gmra.mrb[32].mxu1 %vm634_vm3, %v1788_v36 }
 0x176   : > { %4222 = vmatprep.mubr.msk.bf16.mxu1 %vm634_vm3, %v1794_v58 }
 0x177   : > { %4387 = vmatmul.mubr.msk.bf16.gmra.mrb[32].mxu0 %vm634_vm3, %v3109_v8 }
 0x178   : > { %4390 = vmatprep.mubr.msk.bf16.mxu0 %vm634_vm3, %v3111_v17 }
 0x17d   : > { %4223 = vmatmul.mubr.msk.bf16.gmra.mrb[36].mxu1 %vm634_vm3, %v1803_v20 }
 0x17f   : > { %4391 = vmatmul.mubr.msk.bf16.gmra.mrb[36].mxu0 %vm634_vm3, %v3113_v27 }
 0x1e0   : > { %v4146_v31 = vpop.f32.mrb[0].mxu1 }
 0x1e1   : > { %v1512_v43 = vpop.f32.mrb[1].mxu1 }
 0x1e2   : > { %v4147_v28 = vpop.f32.mrb[2].mxu1 }
 0x1e3   : > { %v1515_v56 = vpop.f32.mrb[3].mxu1 }
 0x1e8   : > { %v4150_v49 = vpop.f32.mrb[4].mxu1 }
 0x1e9   : > { %v1528_v42 = vpop.f32.mrb[5].mxu1 }
 0x1ea   : > { %v4151_v6 = vpop.f32.mrb[6].mxu1 }
 0x1eb   : > { %v1531_v60 = vpop.f32.mrb[7].mxu1 }
 0x1f0   : > { %v4154_v61 = vpop.f32.mrb[8].mxu1 }
 0x1f1   : > { %v1544_v9 = vpop.f32.mrb[9].mxu1 }
 0x1f2   : > { %v4155_v5 = vpop.f32.mrb[10].mxu1 }
 0x1f3   : > { %v1547_v48 = vpop.f32.mrb[11].mxu1 }
 0x1f8   : > { %v4158_v24 = vpop.f32.mrb[12].mxu1 }
 0x1f9   : > { %v1560_v1 = vpop.f32.mrb[13].mxu1 }
 0x1fa   : > { %v5803_v33 = vpop.f32.mrb[14].mxu1 }
 0x1fb   : > { %v5805_v57 = vpop.f32.mrb[15].mxu1 }
 0x200   : > { %v5807_v55 = vpop.f32.mrb[16].mxu1 }
 0x201   : > { %v5809_v2 = vpop.f32.mrb[17].mxu1 }
 0x202   : > { %v5811_v0 = vpop.f32.mrb[18].mxu1 }
 0x203   : > { %v5813_v22 = vpop.f32.mrb[19].mxu1 }
 0x20a   : > { %v4356_v30 = vpop.f32.mrb[0].mxu0 }
 0x20b   : > { %v4396_v4 = vadd.f32 %v4356_v30, %v4146_v31  ;;  %v3211_v34 = vpop.f32.mrb[1].mxu0 }
 0x20c   : > { %v4397_v19 = vadd.f32 %v3211_v34, %v1512_v43  ;;  %v4357_v59 = vpop.f32.mrb[2].mxu0 }
 0x20d   : > { %v3419_v16 = vadd.f32 %v4396_v4, %v5819_v32  ;;  %v4398_v11 = vadd.f32 %v4357_v59, %v4147_v28  ;;  %v3214_v35 = vpop.f32.mrb[3].mxu0 }
 0x20e   : > { %v3417_v10 = vadd.f32 %v4397_v19, %v5819_v32  ;;  %v4399_v62 = vadd.f32 %v3214_v35, %v1515_v56 }
 0x20f   : > { %3460 = vst.msk [vmem:[%s5824_s28 + $0x10] sm:$0xff] %vm3457_vm8, %v3419_v16  ;;  %v3420_v7 = vadd.f32 %v4398_v11, %v5819_v32 }
 0x210   : > { %3458 = vst.msk [vmem:[%s5824_s28] sm:$0xff] %vm3457_vm8, %v3417_v10  ;;  %v3418_v40 = vadd.f32 %v4399_v62, %v5819_v32 }
 0x211   : > { %3461 = vst.msk [vmem:[%s5824_s28 + $0x18] sm:$0xff] %vm3457_vm8, %v3420_v7 }
 0x212   : > { %3459 = vst.msk [vmem:[%s5824_s28 + $0x8] sm:$0xff] %vm3457_vm8, %v3418_v40  ;;  %v4360_v38 = vpop.f32.mrb[4].mxu0 }
 0x213   : > { %v4400_v12 = vadd.f32 %v4360_v38, %v4150_v49  ;;  %v3227_v45 = vpop.f32.mrb[5].mxu0 }
 0x214   : > { %v4401_v47 = vadd.f32 %v3227_v45, %v1528_v42  ;;  %v4361_v39 = vpop.f32.mrb[6].mxu0 }
 0x215   : > { %v3423_v54 = vadd.f32 %v4400_v12, %v5819_v32  ;;  %v4402_v46 = vadd.f32 %v4361_v39, %v4151_v6  ;;  %v3230_v53 = vpop.f32.mrb[7].mxu0 }
 0x216   : > { %v3421_v13 = vadd.f32 %v4401_v47, %v5819_v32  ;;  %v4403_v41 = vadd.f32 %v3230_v53, %v1531_v60 }
 0x217   : > { %3464 = vst.msk [vmem:[%s5824_s28 + $0x30] sm:$0xff] %vm3457_vm8, %v3423_v54  ;;  %v3424_v21 = vadd.f32 %v4402_v46, %v5819_v32 }
 0x218   : > { %3462 = vst.msk [vmem:[%s5824_s28 + $0x20] sm:$0xff] %vm3457_vm8, %v3421_v13  ;;  %v3422_v37 = vadd.f32 %v4403_v41, %v5819_v32 }
 0x219   : > { %3465 = vst.msk [vmem:[%s5824_s28 + $0x38] sm:$0xff] %vm3457_vm8, %v3424_v21 }
 0x21a   : > { %3463 = vst.msk [vmem:[%s5824_s28 + $0x28] sm:$0xff] %vm3457_vm8, %v3422_v37  ;;  %v4364_v15 = vpop.f32.mrb[8].mxu0 }
 0x21b   : > { %v4404_v50 = vadd.f32 %v4364_v15, %v4154_v61  ;;  %v3243_v18 = vpop.f32.mrb[9].mxu0 }
 0x21c   : > { %v4405_v14 = vadd.f32 %v3243_v18, %v1544_v9  ;;  %v4365_v3 = vpop.f32.mrb[10].mxu0 }
 0x21d   : > { %v3427_v52 = vadd.f32 %v4404_v50, %v5819_v32  ;;  %v4406_v63 = vadd.f32 %v4365_v3, %v4155_v5  ;;  %v3246_v25 = vpop.f32.mrb[11].mxu0 }
 0x21e   : > { %v3425_v36 = vadd.f32 %v4405_v14, %v5819_v32  ;;  %v4407_v26 = vadd.f32 %v3246_v25, %v1547_v48 }
 0x21f   : > { %3468 = vst.msk [vmem:[%s5824_s28 + $0x50] sm:$0xff] %vm3457_vm8, %v3427_v52  ;;  %v3428_v29 = vadd.f32 %v4406_v63, %v5819_v32 }
 0x220   : > { %3466 = vst.msk [vmem:[%s5824_s28 + $0x40] sm:$0xff] %vm3457_vm8, %v3425_v36  ;;  %v3426_v23 = vadd.f32 %v4407_v26, %v5819_v32 }
 0x221   : > { %3469 = vst.msk [vmem:[%s5824_s28 + $0x58] sm:$0xff] %vm3457_vm8, %v3428_v29 }
 0x222   : > { %3467 = vst.msk [vmem:[%s5824_s28 + $0x48] sm:$0xff] %vm3457_vm8, %v3426_v23  ;;  %v4368_v58 = vpop.f32.mrb[12].mxu0 }
 0x223   : > { %v4408_v8 = vadd.f32 %v4368_v58, %v4158_v24  ;;  %v3259_v17 = vpop.f32.mrb[13].mxu0 }
 0x224   : > { %v4409_v44 = vadd.f32 %v3259_v17, %v1560_v1  ;;  %v4369_v51 = vpop.f32.mrb[14].mxu0 }
 0x225   : > { %v3431_v20 = vadd.f32 %v4408_v8, %v5819_v32  ;;  %v4410_v27 = vadd.f32 %v4369_v51, %v5803_v33  ;;  %v3262_v31 = vpop.f32.mrb[15].mxu0 }
 0x226   : > { %v3429_v43 = vadd.f32 %v4409_v44, %v5819_v32  ;;  %v4411_v28 = vadd.f32 %v3262_v31, %v5805_v57 }
 0x227   : > { %3472 = vst.msk [vmem:[%s5824_s28 + $0x70] sm:$0xff] %vm3457_vm8, %v3431_v20  ;;  %v3432_v56 = vadd.f32 %v4410_v27, %v5819_v32 }
 0x228   : > { %3470 = vst.msk [vmem:[%s5824_s28 + $0x60] sm:$0xff] %vm3457_vm8, %v3429_v43  ;;  %v3430_v49 = vadd.f32 %v4411_v28, %v5819_v32 }
 0x229   : > { %3473 = vst.msk [vmem:[%s5824_s28 + $0x78] sm:$0xff] %vm3457_vm8, %v3432_v56 }
 0x22a   : > { %3471 = vst.msk [vmem:[%s5824_s28 + $0x68] sm:$0xff] %vm3457_vm8, %v3430_v49  ;;  %v4372_v42 = vpop.f32.mrb[16].mxu0 }
 0x22b   : > { %v4412_v6 = vadd.f32 %v4372_v42, %v5807_v55  ;;  %v3275_v60 = vpop.f32.mrb[17].mxu0 }
 0x22c   : > { %v4413_v61 = vadd.f32 %v3275_v60, %v5809_v2  ;;  %v4373_v9 = vpop.f32.mrb[18].mxu0 }
 0x22d   : > { %v3435_v5 = vadd.f32 %v4412_v6, %v5819_v32  ;;  %v4414_v48 = vadd.f32 %v4373_v9, %v5811_v0  ;;  %v3278_v24 = vpop.f32.mrb[19].mxu0 }
 0x22e   : > { %v3433_v1 = vadd.f32 %v4413_v61, %v5819_v32  ;;  %v4415_v33 = vadd.f32 %v3278_v24, %v5813_v22 }
 0x22f   : > { %3476 = vst.msk [vmem:[%s5824_s28 + $0x90] sm:$0xff] %vm3457_vm8, %v3435_v5  ;;  %v3436_v57 = vadd.f32 %v4414_v48, %v5819_v32 }
 0x230   : > { %v4208_v30 = vpop.f32.mrb[20].mxu1  ;;  %3474 = vst.msk [vmem:[%s5824_s28 + $0x80] sm:$0xff] %vm3457_vm8, %v3433_v1  ;;  %v3434_v55 = vadd.f32 %v4415_v33, %v5819_v32 }
 0x231   : > { %v1981_v2 = vpop.f32.mrb[21].mxu1  ;;  %3477 = vst.msk [vmem:[%s5824_s28 + $0x98] sm:$0xff] %vm3457_vm8, %v3436_v57 }
 0x232   : > { %v4209_v4 = vpop.f32.mrb[22].mxu1  ;;  %3475 = vst.msk [vmem:[%s5824_s28 + $0x88] sm:$0xff] %vm3457_vm8, %v3434_v55  ;;  %v4376_v0 = vpop.f32.mrb[20].mxu0 }
 0x233   : > { %v1984_v34 = vpop.f32.mrb[23].mxu1  ;;  %v4416_v22 = vadd.f32 %v4376_v0, %v4208_v30  ;;  %v3291_v19 = vpop.f32.mrb[21].mxu0 }
 0x234   : > { %v4417_v59 = vadd.f32 %v3291_v19, %v1981_v2  ;;  %v4377_v16 = vpop.f32.mrb[22].mxu0 }
 0x235   : > { %v3439_v11 = vadd.f32 %v4416_v22, %v5819_v32  ;;  %v4418_v35 = vadd.f32 %v4377_v16, %v4209_v4  ;;  %v3294_v10 = vpop.f32.mrb[23].mxu0 }
 0x236   : > { %v3437_v62 = vadd.f32 %v4417_v59, %v5819_v32  ;;  %v4419_v7 = vadd.f32 %v3294_v10, %v1984_v34 }
 0x237   : > { %3480 = vst.msk [vmem:[%s5824_s28 + $0xb0] sm:$0xff] %vm3457_vm8, %v3439_v11  ;;  %v3440_v40 = vadd.f32 %v4418_v35, %v5819_v32 }
 0x238   : > { %v4212_v38 = vpop.f32.mrb[24].mxu1  ;;  %3478 = vst.msk [vmem:[%s5824_s28 + $0xa0] sm:$0xff] %vm3457_vm8, %v3437_v62  ;;  %v3438_v12 = vadd.f32 %v4419_v7, %v5819_v32 }
 0x239   : > { %v1997_v45 = vpop.f32.mrb[25].mxu1  ;;  %3481 = vst.msk [vmem:[%s5824_s28 + $0xb8] sm:$0xff] %vm3457_vm8, %v3440_v40 }
 0x23a   : > { %v4213_v47 = vpop.f32.mrb[26].mxu1  ;;  %3479 = vst.msk [vmem:[%s5824_s28 + $0xa8] sm:$0xff] %vm3457_vm8, %v3438_v12  ;;  %v4380_v39 = vpop.f32.mrb[24].mxu0 }
 0x23b   : > { %v2000_v54 = vpop.f32.mrb[27].mxu1  ;;  %v4420_v46 = vadd.f32 %v4380_v39, %v4212_v38  ;;  %v3307_v53 = vpop.f32.mrb[25].mxu0 }
 0x23c   : > { %v4421_v13 = vadd.f32 %v3307_v53, %v1997_v45  ;;  %v4381_v41 = vpop.f32.mrb[26].mxu0 }
 0x23d   : > { %v3443_v21 = vadd.f32 %v4420_v46, %v5819_v32  ;;  %v4422_v37 = vadd.f32 %v4381_v41, %v4213_v47  ;;  %v3310_v15 = vpop.f32.mrb[27].mxu0 }
 0x23e   : > { %v3441_v50 = vadd.f32 %v4421_v13, %v5819_v32  ;;  %v4423_v18 = vadd.f32 %v3310_v15, %v2000_v54 }
 0x23f   : > { %3484 = vst.msk [vmem:[%s5824_s28 + $0xd0] sm:$0xff] %vm3457_vm8, %v3443_v21  ;;  %v3444_v14 = vadd.f32 %v4422_v37, %v5819_v32 }
 0x240   : > { %v4216_v3 = vpop.f32.mrb[28].mxu1  ;;  %3482 = vst.msk [vmem:[%s5824_s28 + $0xc0] sm:$0xff] %vm3457_vm8, %v3441_v50  ;;  %v3442_v52 = vadd.f32 %v4423_v18, %v5819_v32 }
 0x241   : > { %v2013_v63 = vpop.f32.mrb[29].mxu1  ;;  %3485 = vst.msk [vmem:[%s5824_s28 + $0xd8] sm:$0xff] %vm3457_vm8, %v3444_v14 }
 0x242   : > { %v4217_v25 = vpop.f32.mrb[30].mxu1  ;;  %3483 = vst.msk [vmem:[%s5824_s28 + $0xc8] sm:$0xff] %vm3457_vm8, %v3442_v52  ;;  %v4384_v36 = vpop.f32.mrb[28].mxu0 }
 0x243   : > { %v2016_v26 = vpop.f32.mrb[31].mxu1  ;;  %v4424_v29 = vadd.f32 %v4384_v36, %v4216_v3  ;;  %v3323_v23 = vpop.f32.mrb[29].mxu0 }
 0x244   : > { %v4425_v58 = vadd.f32 %v3323_v23, %v2013_v63  ;;  %v4385_v8 = vpop.f32.mrb[30].mxu0 }
 0x245   : > { %v3447_v17 = vadd.f32 %v4424_v29, %v5819_v32  ;;  %v4426_v44 = vadd.f32 %v4385_v8, %v4217_v25  ;;  %v3326_v51 = vpop.f32.mrb[31].mxu0 }
 0x246   : > { %v3445_v20 = vadd.f32 %v4425_v58, %v5819_v32  ;;  %v4427_v27 = vadd.f32 %v3326_v51, %v2016_v26 }
 0x247   : > { %3488 = vst.msk [vmem:[%s5824_s28 + $0xf0] sm:$0xff] %vm3457_vm8, %v3447_v17  ;;  %v3448_v31 = vadd.f32 %v4426_v44, %v5819_v32 }
 0x248   : > { %v4220_v43 = vpop.f32.mrb[32].mxu1  ;;  %3486 = vst.msk [vmem:[%s5824_s28 + $0xe0] sm:$0xff] %vm3457_vm8, %v3445_v20  ;;  %v3446_v28 = vadd.f32 %v4427_v27, %v5819_v32 }
 0x249   : > { %v2029_v56 = vpop.f32.mrb[33].mxu1  ;;  %3489 = vst.msk [vmem:[%s5824_s28 + $0xf8] sm:$0xff] %vm3457_vm8, %v3448_v31 }
 0x24a   : > { %v4221_v49 = vpop.f32.mrb[34].mxu1  ;;  %3487 = vst.msk [vmem:[%s5824_s28 + $0xe8] sm:$0xff] %vm3457_vm8, %v3446_v28  ;;  %v4388_v42 = vpop.f32.mrb[32].mxu0 }
 0x24b   : > { %v2032_v6 = vpop.f32.mrb[35].mxu1  ;;  %v4428_v60 = vadd.f32 %v4388_v42, %v4220_v43  ;;  %v3339_v61 = vpop.f32.mrb[33].mxu0 }
 0x24c   : > { %v4429_v9 = vadd.f32 %v3339_v61, %v2029_v56  ;;  %v4389_v5 = vpop.f32.mrb[34].mxu0 }
 0x24d   : > { %v3451_v48 = vadd.f32 %v4428_v60, %v5819_v32  ;;  %v4430_v24 = vadd.f32 %v4389_v5, %v4221_v49  ;;  %v3342_v1 = vpop.f32.mrb[35].mxu0 }
 0x24e   : > { %v3449_v33 = vadd.f32 %v4429_v9, %v5819_v32  ;;  %v4431_v57 = vadd.f32 %v3342_v1, %v2032_v6 }
 0x24f   : > { %3492 = vst.msk [vmem:[%s5824_s28 + $0x110] sm:$0xff] %vm3457_vm8, %v3451_v48  ;;  %v3452_v30 = vadd.f32 %v4430_v24, %v5819_v32 }
 0x250   : > { %v4224_v55 = vpop.f32.mrb[36].mxu1  ;;  %3490 = vst.msk [vmem:[%s5824_s28 + $0x100] sm:$0xff] %vm3457_vm8, %v3449_v33  ;;  %v3450_v2 = vadd.f32 %v4431_v57, %v5819_v32 }
 0x251   : > { %v2045_v4 = vpop.f32.mrb[37].mxu1  ;;  %3493 = vst.msk [vmem:[%s5824_s28 + $0x118] sm:$0xff] %vm3457_vm8, %v3452_v30 }
 0x252   : > { %v4225_v0 = vpop.f32.mrb[38].mxu1  ;;  %3491 = vst.msk [vmem:[%s5824_s28 + $0x108] sm:$0xff] %vm3457_vm8, %v3450_v2  ;;  %v4392_v34 = vpop.f32.mrb[36].mxu0 }
 0x253   : > { %v2048_v22 = vpop.f32.mrb[39].mxu1  ;;  %v4432_v19 = vadd.f32 %v4392_v34, %v4224_v55  ;;  %v3355_v59 = vpop.f32.mrb[37].mxu0 }
 0x254   : > { %v4433_v16 = vadd.f32 %v3355_v59, %v2045_v4  ;;  %v4393_v11 = vpop.f32.mrb[38].mxu0 }
 0x255   : > { %v3455_v35 = vadd.f32 %v4432_v19, %v5819_v32  ;;  %v4434_v10 = vadd.f32 %v4393_v11, %v4225_v0  ;;  %v3358_v62 = vpop.f32.mrb[39].mxu0 }
 0x256   : > { %v3453_v7 = vadd.f32 %v4433_v16, %v5819_v32  ;;  %v4435_v40 = vadd.f32 %v3358_v62, %v2048_v22 }
 0x257   : > { %3496 = vst.msk [vmem:[%s5824_s28 + $0x130] sm:$0xff] %vm3457_vm8, %v3455_v35  ;;  %v3456_v38 = vadd.f32 %v4434_v10, %v5819_v32 }
 0x258   : > { %3494 = vst.msk [vmem:[%s5824_s28 + $0x120] sm:$0xff] %vm3457_vm8, %v3453_v7  ;;  %v3454_v12 = vadd.f32 %v4435_v40, %v5819_v32 }
 0x259   : > { %3497 = vst.msk [vmem:[%s5824_s28 + $0x138] sm:$0xff] %vm3457_vm8, %v3456_v38 }
 0x25a   : > { %3495 = vst.msk [vmem:[%s5824_s28 + $0x128] sm:$0xff] %vm3457_vm8, %v3454_v12 }
 0x25b PF: > { %s14_s17 = sadd.s32 1, %s4804_s17   ;;  %s6061_s15 = smov %s4800_s16 }
 0x25c   : > { %p11_p5 = scmp.ge.s32.totalorder %s14_s17, 4   ;;  %s6062_s16 = smov %s6064_s18 }
 0x25e   :  { %13 = sbr.rel (!%p11_p5) target bundleno = 2 (0x2), region = 77 }

</bundles_post_ra>
